<compile_context>
chip_gen: v7x
topology: tpu7x:2x2x1
jax: 0.10.0
libtpu: 0.0.40
codegen_flags: <defaults>
</compile_context>

<pallas_src>
import jax
import jax.numpy as jnp
from jax import lax
from jax.experimental import pallas as pl
from jax.experimental.pallas import tpu as pltpu


_TARGET_BLOCK_BYTES = 2 * 1024 * 1024   # per input block (before double buffering)


def _choose_tiles(H, W, C, itemsize):
    """Pick (TH, TC): lane-dense channel tile + largest H tile under the VMEM target."""
    if C % 128 == 0:
        TC = 128
        while TC * 2 <= 512 and C % (TC * 2) == 0:
            TC *= 2
    else:
        # TODO(synk): for tiny C (< 128 lanes) fold W into the lane dim instead of
        # running with a partially-filled lane axis.
        TC = C
    TH = 1
    for d in range(1, H + 1):
        if H % d == 0 and d * W * TC * itemsize <= _TARGET_BLOCK_BYTES:
            TH = d
    return TH, TC


def _shift_w(t, dw, col_idx):
    """result[:, w, :] = t[:, w + dw, :], zero where w + dw falls outside [0, W).

    Uses an XLU roll plus a single-column mask so the +-1 W taps never materialise
    sublane-misaligned slice copies of the tile.
    """
    _, W, _ = t.shape
    if dw == 0:
        return t
    if W % 8 == 0:
        rolled = pltpu.roll(t, shift=(-dw) % W, axis=1)
        mask = (col_idx >= W - dw) if dw > 0 else (col_idx < -dw)
        return jnp.where(mask, 0, rolled)
    # Fallback for W not a multiple of 8: slice + zero pad (still correct, slower).
    zeros = jnp.zeros_like(t[:, : abs(dw)])
    if dw > 0:
        return jnp.concatenate([t[:, dw:], zeros], axis=1)
    return jnp.concatenate([zeros, t[:, :dw]], axis=1)


def _dwconv_kernel(x_ref, halo_ref, w_ref, b_ref, o_ref):
    # x_ref:    (1, TH, W, TC)   current H-tile, native dtype
    # halo_ref: (1, 2, W, TC)    [0] = row above the tile, [1] = row below (zeros at edges)
    # w_ref:    (3, 3, TC)       depthwise weights, channels-last
    # b_ref:    (1, TC)          bias
    # o_ref:    (1, TH, W, TC)
    _, TH, W, TC = o_ref.shape
    f32 = jnp.float32

    # Row-extended tile [top halo; x; bottom halo]: concat along the leading (row) dim
    # only -> cheap vreg movement, no sublane misalignment.
    xe = jnp.concatenate([halo_ref[0, 0:1], x_ref[0], halo_ref[0, 1:2]], axis=0)

    # The three W (sublane) shifts, computed once and reused by all three H taps.
    col = lax.broadcasted_iota(jnp.int32, (1, W, TC), 1)
    xs = (_shift_w(xe, -1, col), xe, _shift_w(xe, 1, col))       # kw = 0, 1, 2

    # Per-tap weights, pre-sliced to (1, 1, TC) so each broadcast is emitted once.
    wf = w_ref[...].astype(f32)
    wtap = [[wf[kh:kh + 1, kw:kw + 1] for kw in range(3)] for kh in range(3)]

    # Accumulator starts at the bias (saves a separate full-tile bias-add pass).
    acc = jnp.broadcast_to(b_ref[...].astype(f32), (TH, W, TC))
    for kh in range(3):
        for kw in range(3):
            # output row r uses input row r + kh - 1 == row r + kh of the extended tile
            acc = acc + xs[kw][kh:kh + TH].astype(f32) * wtap[kh][kw]

    o_ref[0] = acc.astype(o_ref.dtype)


def _build_halo(x_nhwc, TH):
    """Rows just above/below each H-tile: (B, 2*nH, W, C), zeros at the image border.

    Only ~2/TH of the activation is read (strided slices) -- the activation itself is
    never padded or rewritten in HBM.
    """
    B, H, W, C = x_nhwc.shape
    nH = H // TH
    if nH == 1:
        return jnp.zeros((B, 2, W, C), x_nhwc.dtype)
    zrow = jnp.zeros((B, 1, W, C), x_nhwc.dtype)
    top = jnp.concatenate([zrow, x_nhwc[:, TH - 1:H - TH:TH]], axis=1)   # (B, nH, W, C)
    bot = jnp.concatenate([x_nhwc[:, TH:H:TH], zrow], axis=1)            # (B, nH, W, C)
    return jnp.stack([top, bot], axis=2).reshape(B, 2 * nH, W, C)


def dwconv_pallas(x, weight, bias, H, W, *, tile_h=None, tile_c=None):
    """x: (B, N, C), N == H*W; weight: (C, 1, 3, 3) (PyTorch layout); bias: (C,).

    Returns (B, N, C), matching DWConv.forward (k=3, s=1, p=1, groups=C).
    """
    B, N, C = x.shape
    assert N == H * W, (N, H, W)

    th_auto, tc_auto = _choose_tiles(H, W, C, x.dtype.itemsize)
    TH = th_auto if tile_h is None else tile_h
    TC = tc_auto if tile_c is None else tile_c
    assert H % TH == 0, (H, TH)
    assert C % TC == 0, (C, TC)
    nH, nC = H // TH, C // TC

    # (B, N, C) -> (B, H, W, C): pure metadata reshape (same spatial order as the
    # PyTorch transpose+reshape to NCHW).
    x_nhwc = x.reshape(B, H, W, C)
    halo = _build_halo(x_nhwc, TH)                                  # (B, 2*nH, W, C)
    w_cl = jnp.transpose(weight[:, 0, :, :], (1, 2, 0))             # (3, 3, C)
    b2 = bias.reshape(1, C)

    out_nhwc = pl.pallas_call(
        _dwconv_kernel,
        out_shape=jax.ShapeDtypeStruct((B, H, W, C), x.dtype),
        grid_spec=pltpu.PrefetchScalarGridSpec(
            num_scalar_prefetch=0,
            grid=(B, nC, nH),              # H-tiles innermost: weights stay resident
            in_specs=[
                pl.BlockSpec((1, TH, W, TC), lambda b, ci, hi: (b, hi, 0, ci)),
                pl.BlockSpec((1, 2, W, TC), lambda b, ci, hi: (b, hi, 0, ci)),
                pl.BlockSpec((3, 3, TC), lambda b, ci, hi: (0, 0, ci)),
                pl.BlockSpec((1, TC), lambda b, ci, hi: (0, ci)),
            ],
            out_specs=pl.BlockSpec((1, TH, W, TC), lambda b, ci, hi: (b, hi, 0, ci)),
        ),
        compiler_params=pltpu.CompilerParams(
            dimension_semantics=("parallel", "parallel", "parallel"),
            vmem_limit_bytes=48 * 1024 * 1024,
        ),
    )(x_nhwc, halo, w_cl, b2)

    return out_nhwc.reshape(B, N, C)


def _reference(x, weight, bias, H, W):
    """Pure-JAX reference via grouped lax.conv (depthwise)."""
    B, N, C = x.shape
    x_nchw = jnp.transpose(x, (0, 2, 1)).reshape(B, C, H, W)
    out = lax.conv_general_dilated(
        x_nchw.astype(jnp.float32),
        weight.astype(jnp.float32),            # (C, 1, 3, 3) = (O, I/groups, kH, kW)
        window_strides=(1, 1),
        padding=((1, 1), (1, 1)),
        feature_group_count=C,
        dimension_numbers=("NCHW", "OIHW", "NCHW"),
    ) + bias.reshape(1, C, 1, 1).astype(jnp.float32)
    out = out.reshape(B, C, -1)
    return jnp.transpose(out, (0, 2, 1)).astype(x.dtype)


if __name__ == "__main__":
    B, C, H, W = 2, 4, 16, 16
    N = H * W

    key = jax.random.PRNGKey(0)
    kx, kw, kb = jax.random.split(key, 3)
    x = jax.random.normal(kx, (B, N, C), dtype=jnp.float32)
    # nn.Conv2d(dim, dim, 3, groups=dim) -> weight (dim, 1, 3, 3), bias (dim,)
    weight = jax.random.normal(kw, (C, 1, 3, 3), dtype=jnp.float32) * 0.1
    bias = jax.random.normal(kb, (C,), dtype=jnp.float32) * 0.1

    ref = _reference(x, weight, bias, H, W)

    # 1) auto tiling (single H tile for this small shape)
    out = jax.block_until_ready(dwconv_pallas(x, weight, bias, H, W))
    assert out.shape == (B, N, C)
    assert jnp.allclose(out, ref, atol=1e-4, rtol=1e-4), float(jnp.max(jnp.abs(out - ref)))

    # 2) forced H tiling (exercises the halo rows + roll path, nH = 4)
    out_t = jax.block_until_ready(dwconv_pallas(x, weight, bias, H, W, tile_h=4))
    assert jnp.allclose(out_t, ref, atol=1e-4, rtol=1e-4), float(jnp.max(jnp.abs(out_t - ref)))

    # 3) bf16 end-to-end I/O (f32 accumulation in-kernel), nH = 2
    xb = x.astype(jnp.bfloat16)
    wb = weight.astype(jnp.bfloat16)
    bb = bias.astype(jnp.bfloat16)
    ref_b = _reference(xb, wb, bb, H, W).astype(jnp.float32)
    out_b = jax.block_until_ready(dwconv_pallas(xb, wb, bb, H, W, tile_h=8)).astype(jnp.float32)
    assert jnp.allclose(out_b, ref_b, atol=3e-2, rtol=3e-2), float(jnp.max(jnp.abs(out_b - ref_b)))

    print("KERNEL_OK")
</pallas_src>

<mosaic_0001>
module attributes {stable_mosaic.version = 11 : i64} {
  func.func @_dwconv_kernel(%arg0: i32, %arg1: i32, %arg2: i32, %arg3: memref<1x16x16x4xf32, #tpu.memory_space<vmem>>, %arg4: memref<1x2x16x4xf32, #tpu.memory_space<vmem>>, %arg5: memref<3x3x4xf32, #tpu.memory_space<vmem>>, %arg6: memref<1x4xf32, #tpu.memory_space<vmem>>, %arg7: memref<1x16x16x4xf32, #tpu.memory_space<vmem>>) attributes {dimension_semantics = [#tpu.dimension_semantics<parallel>, #tpu.dimension_semantics<parallel>, #tpu.dimension_semantics<parallel>], iteration_bounds = array<i64: 2, 1, 1>, scalar_prefetch = 0 : i64, scratch_operands = 0 : i64, tpu.core_type = #tpu.core_type<tc>, window_params = [{transform_indices = @transform_0, window_bounds = array<i64: 1, 16, 16, 4>}, {transform_indices = @transform_1, window_bounds = array<i64: 1, 2, 16, 4>}, {transform_indices = @transform_2, window_bounds = array<i64: 3, 3, 4>}, {transform_indices = @transform_3, window_bounds = array<i64: 1, 4>}, {transform_indices = @transform_4, window_bounds = array<i64: 1, 16, 16, 4>}]} {
    %c0 = arith.constant 0 : index
    %c0_0 = arith.constant 0 : index
    %c0_1 = arith.constant 0 : index
    %c0_2 = arith.constant 0 : index
    %0 = vector.load %arg4[%c0, %c0_0, %c0_1, %c0_2] : memref<1x2x16x4xf32, #tpu.memory_space<vmem>>, vector<1x1x16x4xf32>
    %1 = vector.shape_cast %0 : vector<1x1x16x4xf32> to vector<1x16x4xf32>
    %c0_3 = arith.constant 0 : index
    %c0_4 = arith.constant 0 : index
    %c0_5 = arith.constant 0 : index
    %c0_6 = arith.constant 0 : index
    %2 = vector.load %arg3[%c0_3, %c0_4, %c0_5, %c0_6] : memref<1x16x16x4xf32, #tpu.memory_space<vmem>>, vector<1x16x16x4xf32>
    %3 = vector.shape_cast %2 : vector<1x16x16x4xf32> to vector<16x16x4xf32>
    %c0_7 = arith.constant 0 : index
    %c1 = arith.constant 1 : index
    %c0_8 = arith.constant 0 : index
    %c0_9 = arith.constant 0 : index
    %4 = vector.load %arg4[%c0_7, %c1, %c0_8, %c0_9] : memref<1x2x16x4xf32, #tpu.memory_space<vmem>>, vector<1x1x16x4xf32>
    %5 = vector.shape_cast %4 : vector<1x1x16x4xf32> to vector<1x16x4xf32>
    %6 = tpu.concatenate %1, %3, %5 in 0 : vector<1x16x4xf32>, vector<16x16x4xf32>, vector<1x16x4xf32> -> vector<18x16x4xf32>
    %7 = tpu.iota {dimensions = array<i32: 1>} : vector<1x16x4xi32>
    %c1_i32 = arith.constant 1 : i32
    %8 = tpu.dynamic_rotate %6 by %c1_i32 dim 1 : vector<18x16x4xf32>, i32 -> vector<18x16x4xf32>
    %c1_i32_10 = arith.constant 1 : i32
    %9 = vector.broadcast %c1_i32_10 : i32 to vector<1x16x4xi32>
    %10 = arith.cmpi slt, %7, %9 : vector<1x16x4xi32>
    %c0_i32 = arith.constant 0 : i32
    %11 = arith.sitofp %c0_i32 : i32 to f32
    %12 = vector.shape_cast %10 : vector<1x16x4xi1> to vector<1x16x4xi1>
    %13 = vector.broadcast %12 : vector<1x16x4xi1> to vector<18x16x4xi1>
    %14 = vector.broadcast %11 : f32 to vector<18x16x4xf32>
    %15 = arith.select %13, %14, %8 : vector<18x16x4xi1>, vector<18x16x4xf32>
    %c15_i32 = arith.constant 15 : i32
    %16 = tpu.dynamic_rotate %6 by %c15_i32 dim 1 : vector<18x16x4xf32>, i32 -> vector<18x16x4xf32>
    %c15_i32_11 = arith.constant 15 : i32
    %17 = vector.broadcast %c15_i32_11 : i32 to vector<1x16x4xi32>
    %18 = arith.cmpi sge, %7, %17 : vector<1x16x4xi32>
    %c0_i32_12 = arith.constant 0 : i32
    %19 = arith.sitofp %c0_i32_12 : i32 to f32
    %20 = vector.shape_cast %18 : vector<1x16x4xi1> to vector<1x16x4xi1>
    %21 = vector.broadcast %20 : vector<1x16x4xi1> to vector<18x16x4xi1>
    %22 = vector.broadcast %19 : f32 to vector<18x16x4xf32>
    %23 = arith.select %21, %22, %16 : vector<18x16x4xi1>, vector<18x16x4xf32>
    %c0_13 = arith.constant 0 : index
    %c0_14 = arith.constant 0 : index
    %c0_15 = arith.constant 0 : index
    %24 = vector.load %arg5[%c0_13, %c0_14, %c0_15] : memref<3x3x4xf32, #tpu.memory_space<vmem>>, vector<3x3x4xf32>
    %25 = vector.extract_strided_slice %24 {offsets = [0, 0, 0], sizes = [1, 1, 4], strides = [1, 1, 1]} : vector<3x3x4xf32> to vector<1x1x4xf32>
    %26 = vector.extract_strided_slice %24 {offsets = [0, 1, 0], sizes = [1, 1, 4], strides = [1, 1, 1]} : vector<3x3x4xf32> to vector<1x1x4xf32>
    %27 = vector.extract_strided_slice %24 {offsets = [0, 2, 0], sizes = [1, 1, 4], strides = [1, 1, 1]} : vector<3x3x4xf32> to vector<1x1x4xf32>
    %28 = vector.extract_strided_slice %24 {offsets = [1, 0, 0], sizes = [1, 1, 4], strides = [1, 1, 1]} : vector<3x3x4xf32> to vector<1x1x4xf32>
    %29 = vector.extract_strided_slice %24 {offsets = [1, 1, 0], sizes = [1, 1, 4], strides = [1, 1, 1]} : vector<3x3x4xf32> to vector<1x1x4xf32>
    %30 = vector.extract_strided_slice %24 {offsets = [1, 2, 0], sizes = [1, 1, 4], strides = [1, 1, 1]} : vector<3x3x4xf32> to vector<1x1x4xf32>
    %31 = vector.extract_strided_slice %24 {offsets = [2, 0, 0], sizes = [1, 1, 4], strides = [1, 1, 1]} : vector<3x3x4xf32> to vector<1x1x4xf32>
    %32 = vector.extract_strided_slice %24 {offsets = [2, 1, 0], sizes = [1, 1, 4], strides = [1, 1, 1]} : vector<3x3x4xf32> to vector<1x1x4xf32>
    %33 = vector.extract_strided_slice %24 {offsets = [2, 2, 0], sizes = [1, 1, 4], strides = [1, 1, 1]} : vector<3x3x4xf32> to vector<1x1x4xf32>
    %c0_16 = arith.constant 0 : index
    %c0_17 = arith.constant 0 : index
    %34 = vector.load %arg6[%c0_16, %c0_17] : memref<1x4xf32, #tpu.memory_space<vmem>>, vector<1x4xf32>
    %35 = vector.shape_cast %34 : vector<1x4xf32> to vector<1x1x4xf32>
    %36 = vector.broadcast %35 : vector<1x1x4xf32> to vector<16x16x4xf32>
    %37 = vector.extract_strided_slice %15 {offsets = [0, 0, 0], sizes = [16, 16, 4], strides = [1, 1, 1]} : vector<18x16x4xf32> to vector<16x16x4xf32>
    %38 = vector.broadcast %25 : vector<1x1x4xf32> to vector<16x16x4xf32>
    %39 = arith.mulf %37, %38 : vector<16x16x4xf32>
    %40 = arith.addf %36, %39 : vector<16x16x4xf32>
    %41 = vector.extract_strided_slice %6 {offsets = [0, 0, 0], sizes = [16, 16, 4], strides = [1, 1, 1]} : vector<18x16x4xf32> to vector<16x16x4xf32>
    %42 = vector.broadcast %26 : vector<1x1x4xf32> to vector<16x16x4xf32>
    %43 = arith.mulf %41, %42 : vector<16x16x4xf32>
    %44 = arith.addf %40, %43 : vector<16x16x4xf32>
    %45 = vector.extract_strided_slice %23 {offsets = [0, 0, 0], sizes = [16, 16, 4], strides = [1, 1, 1]} : vector<18x16x4xf32> to vector<16x16x4xf32>
    %46 = vector.broadcast %27 : vector<1x1x4xf32> to vector<16x16x4xf32>
    %47 = arith.mulf %45, %46 : vector<16x16x4xf32>
    %48 = arith.addf %44, %47 : vector<16x16x4xf32>
    %49 = vector.extract_strided_slice %15 {offsets = [1, 0, 0], sizes = [16, 16, 4], strides = [1, 1, 1]} : vector<18x16x4xf32> to vector<16x16x4xf32>
    %50 = vector.broadcast %28 : vector<1x1x4xf32> to vector<16x16x4xf32>
    %51 = arith.mulf %49, %50 : vector<16x16x4xf32>
    %52 = arith.addf %48, %51 : vector<16x16x4xf32>
    %53 = vector.extract_strided_slice %6 {offsets = [1, 0, 0], sizes = [16, 16, 4], strides = [1, 1, 1]} : vector<18x16x4xf32> to vector<16x16x4xf32>
    %54 = vector.broadcast %29 : vector<1x1x4xf32> to vector<16x16x4xf32>
    %55 = arith.mulf %53, %54 : vector<16x16x4xf32>
    %56 = arith.addf %52, %55 : vector<16x16x4xf32>
    %57 = vector.extract_strided_slice %23 {offsets = [1, 0, 0], sizes = [16, 16, 4], strides = [1, 1, 1]} : vector<18x16x4xf32> to vector<16x16x4xf32>
    %58 = vector.broadcast %30 : vector<1x1x4xf32> to vector<16x16x4xf32>
    %59 = arith.mulf %57, %58 : vector<16x16x4xf32>
    %60 = arith.addf %56, %59 : vector<16x16x4xf32>
    %61 = vector.extract_strided_slice %15 {offsets = [2, 0, 0], sizes = [16, 16, 4], strides = [1, 1, 1]} : vector<18x16x4xf32> to vector<16x16x4xf32>
    %62 = vector.broadcast %31 : vector<1x1x4xf32> to vector<16x16x4xf32>
    %63 = arith.mulf %61, %62 : vector<16x16x4xf32>
    %64 = arith.addf %60, %63 : vector<16x16x4xf32>
    %65 = vector.extract_strided_slice %6 {offsets = [2, 0, 0], sizes = [16, 16, 4], strides = [1, 1, 1]} : vector<18x16x4xf32> to vector<16x16x4xf32>
    %66 = vector.broadcast %32 : vector<1x1x4xf32> to vector<16x16x4xf32>
    %67 = arith.mulf %65, %66 : vector<16x16x4xf32>
    %68 = arith.addf %64, %67 : vector<16x16x4xf32>
    %69 = vector.extract_strided_slice %23 {offsets = [2, 0, 0], sizes = [16, 16, 4], strides = [1, 1, 1]} : vector<18x16x4xf32> to vector<16x16x4xf32>
    %70 = vector.broadcast %33 : vector<1x1x4xf32> to vector<16x16x4xf32>
    %71 = arith.mulf %69, %70 : vector<16x16x4xf32>
    %72 = arith.addf %68, %71 : vector<16x16x4xf32>
    %c0_18 = arith.constant 0 : index
    %c0_19 = arith.constant 0 : index
    %c0_20 = arith.constant 0 : index
    %c0_21 = arith.constant 0 : index
    %73 = vector.load %arg7[%c0_18, %c0_19, %c0_20, %c0_21] : memref<1x16x16x4xf32, #tpu.memory_space<vmem>>, vector<1x16x16x4xf32>
    %74 = vector.shape_cast %73 : vector<1x16x16x4xf32> to vector<16x16x4xf32>
    %75 = vector.shape_cast %72 : vector<16x16x4xf32> to vector<1x16x16x4xf32>
    tpu.vector_store %arg7[%c0_18, %c0_19, %c0_20, %c0_21], %75 {strides = array<i32>} : memref<1x16x16x4xf32, #tpu.memory_space<vmem>>, vector<1x16x16x4xf32>,
    return
  }
  func.func @transform_0(%arg0: i32, %arg1: i32, %arg2: i32) -> (i32, i32, i32, i32) {
    %c0_i32 = arith.constant 0 : i32
    %c0_i32_0 = arith.constant 0 : i32
    return %arg0, %arg2, %c0_i32, %arg1 : i32, i32, i32, i32
  }
  func.func @transform_1(%arg0: i32, %arg1: i32, %arg2: i32) -> (i32, i32, i32, i32) {
    %c0_i32 = arith.constant 0 : i32
    %c0_i32_0 = arith.constant 0 : i32
    return %arg0, %arg2, %c0_i32, %arg1 : i32, i32, i32, i32
  }
  func.func @transform_2(%arg0: i32, %arg1: i32, %arg2: i32) -> (i32, i32, i32) {
    %c0_i32 = arith.constant 0 : i32
    %c0_i32_0 = arith.constant 0 : i32
    %c0_i32_1 = arith.constant 0 : i32
    return %c0_i32, %c0_i32_0, %arg1 : i32, i32, i32
  }
  func.func @transform_3(%arg0: i32, %arg1: i32, %arg2: i32) -> (i32, i32) {
    %c0_i32 = arith.constant 0 : i32
    %c0_i32_0 = arith.constant 0 : i32
    return %c0_i32, %arg1 : i32, i32
  }
  func.func @transform_4(%arg0: i32, %arg1: i32, %arg2: i32) -> (i32, i32, i32, i32) {
    %c0_i32 = arith.constant 0 : i32
    %c0_i32_0 = arith.constant 0 : i32
    return %arg0, %arg2, %c0_i32, %arg1 : i32, i32, i32, i32
  }
}

</mosaic_0001>

<bundles_post_ra>
// kernel: tpu_custom_call.1
= control target key start
LH: loop header
LB: loop body
LE: loop exit
PB: predicated region body
PF: predicated region fallthrough
CT: control target
= control target key end

     0   :  { %s1531_s15 = smov 0   ;;  %s1533_s16 = smov 0   ;;  %s2624_s0 = inlined_call_operand.vmem [shape: f32[2,16,16,4], index: 0, kind: input, shape index: {}]   ;;  %s2625_s1 = inlined_call_operand.vmem [shape: f32[2,2,16,4], index: 1, kind: input, shape index: {}]   ;;  %s2626_s2 = inlined_call_operand.vmem [shape: f32[3,3,4], index: 2, kind: input, shape index: {}]   ;;  %s2627_s3 = inlined_call_operand.vmem [shape: f32[1,4], index: 3, kind: input, shape index: {}]   ;;  %s2628_s4 = inlined_call_operand.vmem [shape: f32[2,16,16,4], index: 4, kind: output, shape index: {}]  }
   0x1   :  { %s1535_s17 = smov 0  }
   0x2 LB: > { %s33_s18 = sadd.s32 1, %s1500_s16  ;;  %p1442_p0 = scmp.ge.s32.totalorder %s1504_s17, 1  ;;  %s1504_s17 = sphi %s1535_s17, %s14_s17   ;;  %s1500_s16 = sphi %s1533_s16, %s2630_s16   ;;  %s1496_s15 = sphi %s1531_s15, %s2629_s15  }
   0x3   : > { %p35_p1 = scmp.ge.s32.totalorder %s33_s18, 2  ;;  %p238_p2 = scmp.lt.s32.totalorder %s1504_s17, 3 }
   0x5   : > { %s2632_s18 = smov (%p35_p1, %s33_s18), 0  ;;  %p239_p3 = pnand %p1442_p0, %p238_p2 }
   0x6   : > { %p301_p4 = scmp.lt.s32.totalorder (!%p239_p3), %s1496_s15, 1  ;;  %v386_v0 = vlaneseq (!%p239_p3)  ;;  %v618_v2 = vld [vmem:[%s2626_s2] sm:$0x7] (!%p239_p3)  ;;  %v619_v3 = vld [vmem:[%s2626_s2 + $0x4] sm:$0x7] (!%p239_p3)  ;;  %vm1240_vm3 = vcmask (!%p239_p3), 31744  }
   0x7   : > { %242 = sbr.rel (%p239_p3) target bundleno = 215 (0xd7), region = 36  ;;  %v1636_v37 = vld [vmem:[%s2627_s3] ss:$0 sm:$0xff] (!%p239_p3)  ;;  %v620_v43 = vld [vmem:[%s2626_s2 + $0x8] sm:$0x7] (!%p239_p3) }
   0x8   : > { %v1551_v1 = vshrl.u32 (!%p239_p3), %v386_v0, 7 }
   0xa   : > { %v630_v4 = vsub.s32 (!%p239_p3), 0, %v1551_v1  ;;  %v698_v5 = vsub.s32 (!%p239_p3), 1, %v1551_v1  ;;  %vm425_vm0 = vcmp.lt.s32.totalorder (!%p239_p3), %v1551_v1, 1  ;;  %vm539_vm1 = vcmp.lt.s32.totalorder (!%p239_p3), %v1551_v1, 7 }
   0xb   : > { %v766_v6 = vsub.s32 (!%p239_p3), 2, %v1551_v1  ;;  %v1594_v13 = vadd.s32 (!%p239_p3), 8, %v1551_v1 }
   0xc   : > { %v1587_v10 = vrot.slane (!%p239_p3), %v618_v2, %v630_v4  ;;  %v1589_v11 = vrot.slane (!%p239_p3), %v618_v2, %v698_v5  ;;  %v1591_v12 = vrot.slane (!%p239_p3), %v619_v3, %v630_v4  ;;  %v1642_v41 = vrot.slane (!%p239_p3), %v619_v3, %v698_v5 }
   0xd   : > { %v1608_v20 = vrot.slane (!%p239_p3), %v618_v2, %v766_v6  ;;  %v1667_v54 = vrot.slane (!%p239_p3), %v619_v3, %v766_v6  ;;  %v1669_v57 = vrot.slane (!%p239_p3), %v620_v43, %v630_v4  ;;  %v1671_v58 = vrot.slane (!%p239_p3), %v620_v43, %v698_v5 }
   0xe   : > { %s2634_s15 = smov (!%p301_p4, %s1496_s15), 1  ;;  %v1679_v62 = vrot.slane %v620_v43, %v766_v6  ;;  %vm577_vm2 = vcmp.ge.s32.totalorder %v1594_v13, 15 }
   0xf   : > { %s1454_s23 = sshll.u32 %s2634_s15, 8  ;;  %s1455_s24 = sshll.u32 %s2634_s15, 5 }
  0x10   : > { %s1568_s27 = scalar_lea.vmem %s2624_s0, %s1454_s23  ;;  %s1573_s30 = scalar_lea.vmem %s2625_s1, %s1455_s24 }
  0x11   : > { %v1579_v7 = vld [vmem:[%s1573_s30] sm:$0xff]  ;;  %v1582_v8 = vld [vmem:[%s1573_s30 + $0x8] sm:$0xff]  ;;  %v1600_v15 = vld [vmem:[%s1568_s27 + $0x10] sm:$0xff]  ;;  %s1748_s11 = scalar_lea.vmem %s2628_s4, %s1454_s23 }
  0x12   : > { %v1585_v9 = vld [vmem:[%s1568_s27] sm:$0xff]  ;;  %v1597_v14 = vld [vmem:[%s1568_s27 + $0x8] sm:$0xff]  ;;  %v1603_v16 = vld [vmem:[%s1568_s27 + $0x18] sm:$0xff]  ;;  %v389_v17 = vrot.slane %v1579_v7, 7  ;;  %v407_v19 = vrot.slane %v1582_v8, 7  ;;  %v391_v21 = vrot.slane %v1600_v15, 7  ;;  %v700_v45 = vmul.f32 %v1589_v11, %v1579_v7 }
  0x13   : > { %v390_v18 = vrot.slane %v1585_v9, 7  ;;  %v408_v22 = vrot.slane %v1597_v14, 7  ;;  %v409_v23 = vrot.slane %v1603_v16, 7  ;;  %v503_v24 = vrot.slane %v1579_v7, 1  ;;  %v1730_v43 = vld [vmem:[%s1568_s27 + $0x28] sm:$0xff] }
  0x14   : > { %v444_v25 = vsel %vm425_vm0, %v407_v19, %v389_v17  ;;  %v504_v26 = vrot.slane %v1585_v9, 1  ;;  %v505_v27 = vrot.slane %v1600_v15, 1  ;;  %v521_v28 = vrot.slane %v1582_v8, 1 }
  0x15   : > { %v445_v29 = vsel %vm425_vm0, %v408_v22, %v390_v18  ;;  %v446_v30 = vsel %vm425_vm0, %v409_v23, %v391_v21  ;;  %v467_v31 = vsel %vm425_vm0, 0.0, %v444_v25  ;;  %v522_v32 = vrot.slane %v1597_v14, 1 }
  0x16   : > { %v469_v33 = vsel %vm425_vm0, 0.0, %v445_v29  ;;  %v471_v34 = vsel %vm425_vm0, 0.0, %v446_v30  ;;  %v523_v35 = vrot.slane %v1603_v16, 1  ;;  %v540_v36 = vsel %vm539_vm1, %v503_v24, %v521_v28 }
  0x17   : > { %v541_v38 = vsel %vm539_vm1, %v504_v26, %v522_v32  ;;  %v632_v39 = vmul.f32 %v1587_v10, %v467_v31  ;;  %v636_v40 = vmul.f32 %v1587_v10, %v471_v34  ;;  %v1650_v44 = vmul.f32 %v1587_v10, %v469_v33 }
  0x18   : > { %v542_v42 = vsel %vm539_vm1, %v505_v27, %v523_v35  ;;  %v704_v46 = vmul.f32 %v1589_v11, %v1600_v15  ;;  %v768_v49 = vmul.f32 %v1608_v20, %v540_v36  ;;  %v1661_v51 = vmul.f32 %v1608_v20, %v541_v38 }
  0x19   : > { %v664_v47 = vadd.f32 %v1636_v37, %v632_v39  ;;  %v668_v48 = vadd.f32 %v1636_v37, %v636_v40  ;;  %v772_v50 = vmul.f32 %v1608_v20, %v542_v42  ;;  %v836_v52 = vmul.f32 %v1591_v12, %v469_v33 }
  0x1a   : > { %v1665_v53 = vmul.f32 %v1591_v12, %v471_v34  ;;  %v904_v59 = vmul.f32 %v1642_v41, %v1585_v9  ;;  %v972_v60 = vmul.f32 %v1667_v54, %v541_v38  ;;  %v1677_v61 = vmul.f32 %v1667_v54, %v542_v42  ;;  %v1721_v38 = vld [vmem:[%s1568_s27 + $0x20] sm:$0xff] }
  0x1b   : > { %v732_v55 = vadd.f32 %v700_v45, %v664_v47  ;;  %v736_v56 = vadd.f32 %v704_v46, %v668_v48  ;;  %v1040_v2 = vmul.f32 %v1669_v57, %v471_v34  ;;  %v426_v3 = vsel %vm425_vm0, %v389_v17, %v407_v19 }
  0x1c   : > { %v1108_v4 = vmul.f32 %v1671_v58, %v1600_v15  ;;  %v427_v5 = vsel %vm425_vm0, %v390_v18, %v408_v22  ;;  %v428_v7 = vsel %vm425_vm0, %v391_v21, %v409_v23  ;;  %v558_v6 = vsel %vm539_vm1, %v521_v28, %v503_v24 }
  0x1d   : > { %v800_v63 = vadd.f32 %v768_v49, %v732_v55  ;;  %v1681_v0 = vadd.f32 %v772_v50, %v736_v56  ;;  %v559_v29 = vsel %vm539_vm1, %v522_v32, %v504_v26  ;;  %v560_v30 = vsel %vm539_vm1, %v523_v35, %v505_v27 }
  0x1e   : > { %v583_v17 = vsel %vm577_vm2, 0.0, %v558_v6  ;;  %v585_v18 = vsel %vm577_vm2, 0.0, %v559_v29  ;;  %v587_v19 = vsel %vm577_vm2, 0.0, %v560_v30  ;;  %v633_v21 = vmul.f32 %v1587_v10, %v426_v3 }
  0x1f   : > { %v868_v25 = vadd.f32 %v836_v52, %v800_v63  ;;  %v1176_v23 = vmul.f32 %v1679_v62, %v542_v42  ;;  %v637_v24 = vmul.f32 %v1587_v10, %v428_v7  ;;  %v701_v26 = vmul.f32 %v1589_v11, %v1582_v8 }
  0x20   : > { %v635_v27 = vmul.f32 %v1587_v10, %v427_v5  ;;  %v665_v28 = vadd.f32 %v1636_v37, %v633_v21  ;;  %v705_v31 = vmul.f32 %v1589_v11, %v1603_v16  ;;  %v769_v32 = vmul.f32 %v1608_v20, %v583_v17 }
  0x21   : > { %v936_v22 = vadd.f32 %v904_v59, %v868_v25  ;;  %v669_v34 = vadd.f32 %v1636_v37, %v637_v24  ;;  %v1717_v35 = vmul.f32 %v1608_v20, %v585_v18  ;;  %v773_v36 = vmul.f32 %v1608_v20, %v587_v19 }
  0x22   : > { %v733_v8 = vadd.f32 %v701_v26, %v665_v28  ;;  %v837_v39 = vmul.f32 %v1591_v12, %v427_v5  ;;  %v1725_v40 = vmul.f32 %v1591_v12, %v428_v7  ;;  %v905_v42 = vmul.f32 %v1642_v41, %v1597_v14 }
  0x23   : > { %v1004_v33 = vadd.f32 %v972_v60, %v936_v22  ;;  %v737_v46 = vadd.f32 %v705_v31, %v669_v34  ;;  %v973_v47 = vmul.f32 %v1667_v54, %v585_v18  ;;  %v1734_v48 = vmul.f32 %v1667_v54, %v587_v19 }
  0x24   : > { %v801_v49 = vadd.f32 %v769_v32, %v733_v8  ;;  %v1041_v50 = vmul.f32 %v1669_v57, %v428_v7  ;;  %v1109_v52 = vmul.f32 %v1671_v58, %v1603_v16  ;;  %v392_v55 = vrot.slane %v1721_v38, 7 }
  0x25   : > { %v1072_v45 = vadd.f32 %v1040_v2, %v1004_v33  ;;  %v1177_v59 = vmul.f32 %v1679_v62, %v587_v19  ;;  %v410_v60 = vrot.slane %v1730_v43, 7  ;;  %v506_v63 = vrot.slane %v1721_v38, 1 }
  0x26   : > { %v869_v2 = vadd.f32 %v837_v39, %v801_v49  ;;  %v524_v3 = vrot.slane %v1730_v43, 1  ;;  %v666_v5 = vadd.f32 %v1636_v37, %v1650_v44  ;;  %v1755_v6 = vadd.f32 %v773_v36, %v737_v46 }
  0x27   : > { %v1140_v56 = vadd.f32 %v1108_v4, %v1072_v45  ;;  %v702_v4 = vmul.f32 %v1589_v11, %v1585_v9  ;;  %v447_v25 = vsel %vm425_vm0, %v410_v60, %v392_v55  ;;  %v706_v29 = vmul.f32 %v1589_v11, %v1721_v38 }
  0x28   : > { %v937_v30 = vadd.f32 %v905_v42, %v869_v2  ;;  %v473_v17 = vsel %vm425_vm0, 0.0, %v447_v25  ;;  %v543_v18 = vsel %vm539_vm1, %v506_v63, %v524_v3  ;;  %v906_v22 = vmul.f32 %v1642_v41, %v1600_v15 }
  0x29   : > { %v1208_v7 = vadd.f32 %v1176_v23, %v1140_v56  ;;  %v734_v44 = vadd.f32 %v702_v4, %v666_v5  ;;  %v638_v9 = vmul.f32 %v1587_v10, %v473_v17  ;;  %v774_v19 = vmul.f32 %v1608_v20, %v543_v18 }
  0x2a   : > { %v840_v21 = vmul.f32 %v1591_v12, %v473_v17  ;;  %v1005_v23 = vadd.f32 %v973_v47, %v937_v30  ;;  %v1774_v26 = vmul.f32 %v1667_v54, %v543_v18  ;;  %v1042_v28 = vmul.f32 %v1669_v57, %v473_v17 }
  0x2b   : > { %1241 = vst.msk [vmem:[%s1748_s11] sm:$0xff] %vm1240_vm3, %v1208_v7  ;;  %v802_v24 = vadd.f32 %v1661_v51, %v734_v44  ;;  %v670_v31 = vadd.f32 %v1636_v37, %v638_v9  ;;  %v1110_v32 = vmul.f32 %v1671_v58, %v1721_v38  ;;  %v429_v33 = vsel %vm425_vm0, %v392_v55, %v410_v60 }
  0x2c   : > { %v561_v34 = vsel %vm539_vm1, %v524_v3, %v506_v63  ;;  %v1073_v15 = vadd.f32 %v1041_v50, %v1005_v23  ;;  %v639_v8 = vmul.f32 %v1587_v10, %v429_v33  ;;  %v667_v42 = vadd.f32 %v1636_v37, %v635_v27  ;;  %v1800_v63 = vld [vmem:[%s1568_s27 + $0x30] sm:$0xff] }
  0x2d   : > { %v870_v51 = vadd.f32 %v1665_v53, %v802_v24  ;;  %v589_v36 = vsel %vm577_vm2, 0.0, %v561_v34  ;;  %v738_v39 = vadd.f32 %v706_v29, %v670_v31  ;;  %v703_v45 = vmul.f32 %v1589_v11, %v1597_v14  ;;  %v1803_v14 = vld [vmem:[%s1568_s27 + $0x38] sm:$0xff] }
  0x2e   : > { %v707_v46 = vmul.f32 %v1589_v11, %v1730_v43  ;;  %v1141_v47 = vadd.f32 %v1109_v52, %v1073_v15  ;;  %v1178_v50 = vmul.f32 %v1679_v62, %v543_v18  ;;  %v671_v53 = vadd.f32 %v1636_v37, %v639_v8 }
  0x2f   : > { %v938_v49 = vadd.f32 %v906_v22, %v870_v51  ;;  %v1795_v55 = vadd.f32 %v774_v19, %v738_v39  ;;  %v735_v56 = vadd.f32 %v703_v45, %v667_v42  ;;  %v775_v60 = vmul.f32 %v1608_v20, %v589_v36 }
  0x30   : > { %v841_v27 = vmul.f32 %v1591_v12, %v429_v33  ;;  %v1209_v2 = vadd.f32 %v1177_v59, %v1141_v47  ;;  %v739_v3 = vadd.f32 %v707_v46, %v671_v53  ;;  %v907_v5 = vmul.f32 %v1642_v41, %v1603_v16 }
  0x31   : > { %v1006_v52 = vadd.f32 %v1677_v61, %v938_v49  ;;  %v803_v4 = vadd.f32 %v1717_v35, %v735_v56  ;;  %v1810_v7 = vmul.f32 %v1667_v54, %v589_v36  ;;  %v1043_v25 = vmul.f32 %v1669_v57, %v429_v33 }
  0x32   : > { %v1111_v29 = vmul.f32 %v1671_v58, %v1730_v43  ;;  %1242 = vst.msk [vmem:[%s1748_s11 + $0x8] sm:$0xff] %vm1240_vm3, %v1209_v2  ;;  %v1179_v59 = vmul.f32 %v1679_v62, %v589_v36  ;;  %v393_v61 = vrot.slane %v1800_v63, 7  ;;  %v411_v17 = vrot.slane %v1803_v14, 7 }
  0x33   : > { %v1074_v30 = vadd.f32 %v1042_v28, %v1006_v52  ;;  %v1820_v16 = vadd.f32 %v775_v60, %v739_v3  ;;  %v871_v35 = vadd.f32 %v1725_v40, %v803_v4  ;;  %v507_v18 = vrot.slane %v1800_v63, 1  ;;  %v1862_v3 = vld [vmem:[%s1568_s27 + $0x40] sm:$0xff] }
  0x34   : > { %v525_v44 = vrot.slane %v1803_v14, 1  ;;  %v448_v19 = vsel %vm425_vm0, %v411_v17, %v393_v61  ;;  %v872_v22 = vadd.f32 %v840_v21, %v1681_v0  ;;  %v908_v23 = vmul.f32 %v1642_v41, %v1721_v38 }
  0x35   : > { %v1142_v9 = vadd.f32 %v1110_v32, %v1074_v30  ;;  %v939_v24 = vadd.f32 %v907_v5, %v871_v35  ;;  %v475_v28 = vsel %vm425_vm0, 0.0, %v448_v19  ;;  %v708_v31 = vmul.f32 %v1589_v11, %v1800_v63  ;;  %v1865_v5 = vld [vmem:[%s1568_s27 + $0x48] sm:$0xff] }
  0x36   : > { %v544_v40 = vsel %vm539_vm1, %v507_v18, %v525_v44  ;;  %v640_v33 = vmul.f32 %v1587_v10, %v475_v28  ;;  %v1112_v0 = vmul.f32 %v1671_v58, %v1800_v63  ;;  %v842_v21 = vmul.f32 %v1591_v12, %v475_v28 }
  0x37   : > { %v1210_v32 = vadd.f32 %v1178_v50, %v1142_v9  ;;  %v776_v34 = vmul.f32 %v1608_v20, %v544_v40  ;;  %v1007_v38 = vadd.f32 %v1734_v48, %v939_v24  ;;  %v940_v15 = vadd.f32 %v908_v23, %v872_v22 }
  0x38   : > { %v1044_v51 = vmul.f32 %v1669_v57, %v475_v28  ;;  %v672_v36 = vadd.f32 %v1636_v37, %v640_v33  ;;  %v978_v8 = vmul.f32 %v1667_v54, %v544_v40  ;;  %v430_v39 = vsel %vm425_vm0, %v393_v61, %v411_v17 }
  0x39   : > { %1243 = vst.msk [vmem:[%s1748_s11 + $0x10] sm:$0xff] %vm1240_vm3, %v1210_v32  ;;  %v562_v42 = vsel %vm539_vm1, %v525_v44, %v507_v18  ;;  %v1075_v48 = vadd.f32 %v1043_v25, %v1007_v38  ;;  %v1008_v45 = vadd.f32 %v1774_v26, %v940_v15  ;;  %v641_v47 = vmul.f32 %v1587_v10, %v430_v39 }
  0x3a   : > { %v591_v46 = vsel %vm577_vm2, 0.0, %v562_v42  ;;  %v740_v49 = vadd.f32 %v708_v31, %v672_v36  ;;  %v1180_v50 = vmul.f32 %v1679_v62, %v544_v40  ;;  %v709_v53 = vmul.f32 %v1589_v11, %v1803_v14 }
  0x3b   : > { %v777_v56 = vmul.f32 %v1608_v20, %v591_v46  ;;  %v1143_v60 = vadd.f32 %v1111_v29, %v1075_v48  ;;  %v1076_v2 = vadd.f32 %v1044_v51, %v1008_v45  ;;  %v673_v52 = vadd.f32 %v1636_v37, %v641_v47 }
  0x3c   : > { %v873_v26 = vadd.f32 %v841_v27, %v1755_v6  ;;  %v1867_v4 = vadd.f32 %v776_v34, %v740_v49  ;;  %v843_v25 = vmul.f32 %v1591_v12, %v430_v39  ;;  %v909_v30 = vmul.f32 %v1642_v41, %v1730_v43 }
  0x3d   : > { %v1873_v61 = vmul.f32 %v1667_v54, %v591_v46  ;;  %v1211_v29 = vadd.f32 %v1179_v59, %v1143_v60  ;;  %v1144_v17 = vadd.f32 %v1112_v0, %v1076_v2  ;;  %v741_v35 = vadd.f32 %v709_v53, %v673_v52 }
  0x3e   : > { %v1045_v6 = vmul.f32 %v1669_v57, %v430_v39  ;;  %v941_v27 = vadd.f32 %v909_v30, %v873_v26  ;;  %v1113_v18 = vmul.f32 %v1671_v58, %v1803_v14  ;;  %v394_v44 = vrot.slane %v1862_v3, 7  ;;  %v1925_v30 = vld [vmem:[%s1568_s27 + $0x50] sm:$0xff] }
  0x3f   : > { %v412_v9 = vrot.slane %v1865_v5, 7  ;;  %1244 = vst.msk [vmem:[%s1748_s11 + $0x18] sm:$0xff] %vm1240_vm3, %v1211_v29  ;;  %v1212_v43 = vadd.f32 %v1180_v50, %v1144_v17  ;;  %v1181_v19 = vmul.f32 %v1679_v62, %v591_v46  ;;  %v508_v59 = vrot.slane %v1862_v3, 1  ;;  %v1928_v29 = vld [vmem:[%s1568_s27 + $0x58] sm:$0xff] }
  0x40   : > { %v526_v22 = vrot.slane %v1865_v5, 1  ;;  %v1885_v23 = vadd.f32 %v777_v56, %v741_v35  ;;  %v1009_v24 = vadd.f32 %v1810_v7, %v941_v27  ;;  %v874_v40 = vadd.f32 %v842_v21, %v1795_v55 }
  0x41   : > { %v449_v28 = vsel %vm425_vm0, %v412_v9, %v394_v44  ;;  %1245 = vst.msk [vmem:[%s1748_s11 + $0x20] sm:$0xff] %vm1240_vm3, %v1212_v43  ;;  %v710_v33 = vmul.f32 %v1589_v11, %v1862_v3  ;;  %v910_v34 = vmul.f32 %v1642_v41, %v1800_v63  ;;  %v1114_v55 = vmul.f32 %v1671_v58, %v1862_v3 }
  0x42   : > { %v477_v31 = vsel %vm425_vm0, 0.0, %v449_v28  ;;  %v545_v32 = vsel %vm539_vm1, %v508_v59, %v526_v22  ;;  %v1077_v7 = vadd.f32 %v1045_v6, %v1009_v24  ;;  %v431_v63 = vsel %vm425_vm0, %v394_v44, %v412_v9 }
  0x43   : > { %v642_v0 = vmul.f32 %v1587_v10, %v477_v31  ;;  %v778_v38 = vmul.f32 %v1608_v20, %v545_v32  ;;  %v844_v21 = vmul.f32 %v1591_v12, %v477_v31  ;;  %v942_v15 = vadd.f32 %v910_v34, %v874_v40 }
  0x44   : > { %v980_v51 = vmul.f32 %v1667_v54, %v545_v32  ;;  %v1046_v36 = vmul.f32 %v1669_v57, %v477_v31  ;;  %v1145_v39 = vadd.f32 %v1113_v18, %v1077_v7  ;;  %v563_v48 = vsel %vm539_vm1, %v526_v22, %v508_v59 }
  0x45   : > { %v674_v42 = vadd.f32 %v1636_v37, %v642_v0  ;;  %v1010_v45 = vadd.f32 %v978_v8, %v942_v15  ;;  %v593_v46 = vsel %vm577_vm2, 0.0, %v563_v48  ;;  %v643_v47 = vmul.f32 %v1587_v10, %v431_v63 }
  0x46   : > { %v711_v49 = vmul.f32 %v1589_v11, %v1865_v5  ;;  %v1213_v50 = vadd.f32 %v1181_v19, %v1145_v39  ;;  %v1182_v56 = vmul.f32 %v1679_v62, %v545_v32  ;;  %v779_v60 = vmul.f32 %v1608_v20, %v593_v46 }
  0x47   : > { %v742_v53 = vadd.f32 %v710_v33, %v674_v42  ;;  %v1078_v2 = vadd.f32 %v1046_v36, %v1010_v45  ;;  %v675_v52 = vadd.f32 %v1636_v37, %v643_v47  ;;  %v875_v26 = vadd.f32 %v843_v25, %v1820_v16 }
  0x48   : > { %v911_v8 = vmul.f32 %v1642_v41, %v1803_v14  ;;  %1246 = vst.msk [vmem:[%s1748_s11 + $0x28] sm:$0xff] %vm1240_vm3, %v1213_v50  ;;  %v845_v35 = vmul.f32 %v1591_v12, %v431_v63  ;;  %v1936_v6 = vmul.f32 %v1667_v54, %v593_v46  ;;  %v1047_v27 = vmul.f32 %v1669_v57, %v431_v63 }
  0x49   : > { %v1932_v17 = vadd.f32 %v778_v38, %v742_v53  ;;  %v1146_v18 = vadd.f32 %v1114_v55, %v1078_v2  ;;  %v743_v16 = vadd.f32 %v711_v49, %v675_v52  ;;  %v1115_v14 = vmul.f32 %v1671_v58, %v1865_v5  ;;  %v1983_v2 = vld [vmem:[%s1568_s27 + $0x60] sm:$0xff]  ;;  %v1986_v52 = vld [vmem:[%s1568_s27 + $0x68] sm:$0xff] }
  0x4a   : > { %v943_v25 = vadd.f32 %v911_v8, %v875_v26  ;;  %v395_v44 = vrot.slane %v1925_v30, 7  ;;  %v413_v9 = vrot.slane %v1928_v29, 7  ;;  %v509_v43 = vrot.slane %v1925_v30, 1 }
  0x4b   : > { %v527_v19 = vrot.slane %v1928_v29, 1  ;;  %v1214_v59 = vadd.f32 %v1182_v56, %v1146_v18  ;;  %v1945_v22 = vadd.f32 %v779_v60, %v743_v16  ;;  %v1183_v28 = vmul.f32 %v1679_v62, %v593_v46 }
  0x4c   : > { %v1011_v24 = vadd.f32 %v1873_v61, %v943_v25  ;;  %v450_v40 = vsel %vm425_vm0, %v413_v9, %v395_v44  ;;  %v876_v32 = vadd.f32 %v844_v21, %v1867_v4  ;;  %v912_v33 = vmul.f32 %v1642_v41, %v1862_v3 }
  0x4d   : > { %v546_v31 = vsel %vm539_vm1, %v509_v43, %v527_v19  ;;  %1247 = vst.msk [vmem:[%s1748_s11 + $0x30] sm:$0xff] %vm1240_vm3, %v1214_v59  ;;  %v479_v7 = vsel %vm425_vm0, 0.0, %v450_v40  ;;  %v712_v61 = vmul.f32 %v1589_v11, %v1925_v30  ;;  %v1116_v36 = vmul.f32 %v1671_v58, %v1925_v30 }
  0x4e   : > { %v1079_v34 = vadd.f32 %v1047_v27, %v1011_v24  ;;  %v780_v0 = vmul.f32 %v1608_v20, %v546_v31  ;;  %v644_v38 = vmul.f32 %v1587_v10, %v479_v7  ;;  %v944_v55 = vadd.f32 %v912_v33, %v876_v32 }
  0x4f   : > { %v982_v15 = vmul.f32 %v1667_v54, %v546_v31  ;;  %v1048_v4 = vmul.f32 %v1669_v57, %v479_v7  ;;  %v846_v3 = vmul.f32 %v1591_v12, %v479_v7  ;;  %v432_v39 = vsel %vm425_vm0, %v395_v44, %v413_v9 }
  0x50   : > { %v1147_v21 = vadd.f32 %v1115_v14, %v1079_v34  ;;  %v676_v42 = vadd.f32 %v1636_v37, %v644_v38  ;;  %v1012_v63 = vadd.f32 %v980_v51, %v944_v55  ;;  %v564_v48 = vsel %vm539_vm1, %v527_v19, %v509_v43 }
  0x51   : > { %v645_v45 = vmul.f32 %v1587_v10, %v432_v39  ;;  %v1184_v47 = vmul.f32 %v1679_v62, %v546_v31  ;;  %v595_v49 = vsel %vm577_vm2, 0.0, %v564_v48  ;;  %v713_v50 = vmul.f32 %v1589_v11, %v1928_v29 }
  0x52   : > { %v1215_v46 = vadd.f32 %v1183_v28, %v1147_v21  ;;  %v744_v53 = vadd.f32 %v712_v61, %v676_v42  ;;  %v1080_v56 = vadd.f32 %v1048_v4, %v1012_v63  ;;  %v847_v51 = vmul.f32 %v1591_v12, %v432_v39 }
  0x53   : > { %v677_v60 = vadd.f32 %v1636_v37, %v645_v45  ;;  %v781_v26 = vmul.f32 %v1608_v20, %v595_v49  ;;  %v877_v8 = vadd.f32 %v845_v35, %v1885_v23  ;;  %v913_v27 = vmul.f32 %v1642_v41, %v1865_v5 }
  0x54   : > { %1248 = vst.msk [vmem:[%s1748_s11 + $0x38] sm:$0xff] %vm1240_vm3, %v1215_v46  ;;  %v1995_v18 = vmul.f32 %v1667_v54, %v595_v49  ;;  %v1997_v16 = vadd.f32 %v780_v0, %v744_v53  ;;  %v1148_v25 = vadd.f32 %v1116_v36, %v1080_v56  ;;  %v1049_v44 = vmul.f32 %v1669_v57, %v432_v39 }
  0x55   : > { %v745_v14 = vadd.f32 %v713_v50, %v677_v60  ;;  %v945_v9 = vadd.f32 %v913_v27, %v877_v8  ;;  %v1117_v43 = vmul.f32 %v1671_v58, %v1928_v29  ;;  %v396_v19 = vrot.slane %v1983_v2, 7  ;;  %v2047_v8 = vld [vmem:[%s1568_s27 + $0x70] sm:$0xff]  ;;  %v2050_v27 = vld [vmem:[%s1568_s27 + $0x78] sm:$0xff] }
  0x56   : > { %v414_v23 = vrot.slane %v1986_v52, 7  ;;  %v1216_v35 = vadd.f32 %v1184_v47, %v1148_v25  ;;  %v1185_v5 = vmul.f32 %v1679_v62, %v595_v49  ;;  %v510_v59 = vrot.slane %v1983_v2, 1 }
  0x57   : > { %v528_v24 = vrot.slane %v1986_v52, 1  ;;  %v2007_v28 = vadd.f32 %v781_v26, %v745_v14  ;;  %v1013_v40 = vadd.f32 %v1936_v6, %v945_v9  ;;  %v878_v32 = vadd.f32 %v846_v3, %v1932_v17 }
  0x58   : > { %v451_v31 = vsel %vm425_vm0, %v414_v23, %v396_v19  ;;  %1249 = vst.msk [vmem:[%s1748_s11 + $0x40] sm:$0xff] %vm1240_vm3, %v1216_v35  ;;  %v714_v7 = vmul.f32 %v1589_v11, %v1983_v2  ;;  %v914_v61 = vmul.f32 %v1642_v41, %v1925_v30  ;;  %v1118_v17 = vmul.f32 %v1671_v58, %v1983_v2 }
  0x59   : > { %v481_v33 = vsel %vm425_vm0, 0.0, %v451_v31  ;;  %v547_v34 = vsel %vm539_vm1, %v510_v59, %v528_v24  ;;  %v1081_v6 = vadd.f32 %v1049_v44, %v1013_v40  ;;  %v433_v30 = vsel %vm425_vm0, %v396_v19, %v414_v23 }
  0x5a   : > { %v646_v0 = vmul.f32 %v1587_v10, %v481_v33  ;;  %v782_v38 = vmul.f32 %v1608_v20, %v547_v34  ;;  %v848_v55 = vmul.f32 %v1591_v12, %v481_v33  ;;  %v946_v4 = vadd.f32 %v914_v61, %v878_v32 }
  0x5b   : > { %v984_v21 = vmul.f32 %v1667_v54, %v547_v34  ;;  %v1050_v3 = vmul.f32 %v1669_v57, %v481_v33  ;;  %v1149_v36 = vadd.f32 %v1117_v43, %v1081_v6  ;;  %v565_v42 = vsel %vm539_vm1, %v528_v24, %v510_v59 }
  0x5c   : > { %v678_v39 = vadd.f32 %v1636_v37, %v646_v0  ;;  %v1014_v63 = vadd.f32 %v982_v15, %v946_v4  ;;  %v597_v48 = vsel %vm577_vm2, 0.0, %v565_v42  ;;  %v647_v45 = vmul.f32 %v1587_v10, %v433_v30 }
  0x5d   : > { %v715_v46 = vmul.f32 %v1589_v11, %v1986_v52  ;;  %v1217_v47 = vadd.f32 %v1185_v5, %v1149_v36  ;;  %v1186_v50 = vmul.f32 %v1679_v62, %v547_v34  ;;  %v783_v53 = vmul.f32 %v1608_v20, %v597_v48 }
  0x5e   : > { %v746_v49 = vadd.f32 %v714_v7, %v678_v39  ;;  %v1082_v56 = vadd.f32 %v1050_v3, %v1014_v63  ;;  %v679_v60 = vadd.f32 %v1636_v37, %v647_v45  ;;  %v879_v26 = vadd.f32 %v847_v51, %v1945_v22 }
  0x5f   : > { %v915_v15 = vmul.f32 %v1642_v41, %v1928_v29  ;;  %1250 = vst.msk [vmem:[%s1748_s11 + $0x48] sm:$0xff] %vm1240_vm3, %v1217_v47  ;;  %v849_v14 = vmul.f32 %v1591_v12, %v433_v30  ;;  %v2058_v44 = vmul.f32 %v1667_v54, %v597_v48  ;;  %v1051_v9 = vmul.f32 %v1669_v57, %v433_v30 }
  0x60   : > { %v2054_v25 = vadd.f32 %v782_v38, %v746_v49  ;;  %v1150_v43 = vadd.f32 %v1118_v17, %v1082_v56  ;;  %v747_v22 = vadd.f32 %v715_v46, %v679_v60  ;;  %v1119_v29 = vmul.f32 %v1671_v58, %v1986_v52  ;;  %v2105_v56 = vld [vmem:[%s1568_s27 + $0x80] sm:$0xff]  ;;  %v2108_v60 = vld [vmem:[%s1568_s27 + $0x88] sm:$0xff] }
  0x61   : > { %v947_v51 = vadd.f32 %v915_v15, %v879_v26  ;;  %v397_v19 = vrot.slane %v2047_v8, 7  ;;  %v415_v23 = vrot.slane %v2050_v27, 7  ;;  %v511_v35 = vrot.slane %v2047_v8, 1 }
  0x62   : > { %v529_v5 = vrot.slane %v2050_v27, 1  ;;  %v1218_v59 = vadd.f32 %v1186_v50, %v1150_v43  ;;  %v2067_v24 = vadd.f32 %v783_v53, %v747_v22  ;;  %v1187_v31 = vmul.f32 %v1679_v62, %v597_v48 }
  0x63   : > { %v1015_v40 = vadd.f32 %v1995_v18, %v947_v51  ;;  %v452_v32 = vsel %vm425_vm0, %v415_v23, %v397_v19  ;;  %v880_v34 = vadd.f32 %v848_v55, %v1997_v16  ;;  %v916_v7 = vmul.f32 %v1642_v41, %v1983_v2 }
  0x64   : > { %v548_v33 = vsel %vm539_vm1, %v511_v35, %v529_v5  ;;  %1251 = vst.msk [vmem:[%s1748_s11 + $0x50] sm:$0xff] %vm1240_vm3, %v1218_v59  ;;  %v483_v6 = vsel %vm425_vm0, 0.0, %v452_v32  ;;  %v716_v18 = vmul.f32 %v1589_v11, %v2047_v8  ;;  %v1120_v3 = vmul.f32 %v1671_v58, %v2047_v8 }
  0x65   : > { %v1083_v61 = vadd.f32 %v1051_v9, %v1015_v40  ;;  %v784_v0 = vmul.f32 %v1608_v20, %v548_v33  ;;  %v648_v38 = vmul.f32 %v1587_v10, %v483_v6  ;;  %v948_v17 = vadd.f32 %v916_v7, %v880_v34 }
  0x66   : > { %v986_v4 = vmul.f32 %v1667_v54, %v548_v33  ;;  %v1052_v16 = vmul.f32 %v1669_v57, %v483_v6  ;;  %v850_v2 = vmul.f32 %v1591_v12, %v483_v6  ;;  %v434_v36 = vsel %vm425_vm0, %v397_v19, %v415_v23 }
  0x67   : > { %v1151_v55 = vadd.f32 %v1119_v29, %v1083_v61  ;;  %v680_v39 = vadd.f32 %v1636_v37, %v648_v38  ;;  %v1016_v30 = vadd.f32 %v984_v21, %v948_v17  ;;  %v566_v42 = vsel %vm539_vm1, %v529_v5, %v511_v35 }
  0x68   : > { %v649_v63 = vmul.f32 %v1587_v10, %v434_v36  ;;  %v1188_v45 = vmul.f32 %v1679_v62, %v548_v33  ;;  %v599_v46 = vsel %vm577_vm2, 0.0, %v566_v42  ;;  %v717_v47 = vmul.f32 %v1589_v11, %v2050_v27 }
  0x69   : > { %v1219_v48 = vadd.f32 %v1187_v31, %v1151_v55  ;;  %v748_v49 = vadd.f32 %v716_v18, %v680_v39  ;;  %v1084_v50 = vadd.f32 %v1052_v16, %v1016_v30  ;;  %v851_v21 = vmul.f32 %v1591_v12, %v434_v36 }
  0x6a   : > { %v681_v53 = vadd.f32 %v1636_v37, %v649_v63  ;;  %v785_v26 = vmul.f32 %v1608_v20, %v599_v46  ;;  %v881_v15 = vadd.f32 %v849_v14, %v2007_v28  ;;  %v917_v9 = vmul.f32 %v1642_v41, %v1986_v52 }
  0x6b   : > { %1252 = vst.msk [vmem:[%s1748_s11 + $0x58] sm:$0xff] %vm1240_vm3, %v1219_v48  ;;  %v2117_v43 = vmul.f32 %v1667_v54, %v599_v46  ;;  %v2119_v22 = vadd.f32 %v784_v0, %v748_v49  ;;  %v1152_v51 = vadd.f32 %v1120_v3, %v1084_v50  ;;  %v1053_v19 = vmul.f32 %v1669_v57, %v434_v36 }
  0x6c   : > { %v749_v29 = vadd.f32 %v717_v47, %v681_v53  ;;  %v949_v23 = vadd.f32 %v917_v9, %v881_v15  ;;  %v1121_v35 = vmul.f32 %v1671_v58, %v2050_v27  ;;  %v398_v5 = vrot.slane %v2105_v56, 7  ;;  %v2169_v15 = vld [vmem:[%s1568_s27 + $0x90] sm:$0xff]  ;;  %v2172_v9 = vld [vmem:[%s1568_s27 + $0x98] sm:$0xff] }
  0x6d   : > { %v416_v28 = vrot.slane %v2108_v60, 7  ;;  %v1220_v14 = vadd.f32 %v1188_v45, %v1152_v51  ;;  %v1189_v52 = vmul.f32 %v1679_v62, %v599_v46  ;;  %v512_v59 = vrot.slane %v2105_v56, 1 }
  0x6e   : > { %v530_v40 = vrot.slane %v2108_v60, 1  ;;  %v2129_v31 = vadd.f32 %v785_v26, %v749_v29  ;;  %v1017_v32 = vadd.f32 %v2058_v44, %v949_v23  ;;  %v882_v34 = vadd.f32 %v850_v2, %v2054_v25 }
  0x6f   : > { %v453_v33 = vsel %vm425_vm0, %v416_v28, %v398_v5  ;;  %1253 = vst.msk [vmem:[%s1748_s11 + $0x60] sm:$0xff] %vm1240_vm3, %v1220_v14  ;;  %v718_v6 = vmul.f32 %v1589_v11, %v2105_v56  ;;  %v918_v18 = vmul.f32 %v1642_v41, %v2047_v8  ;;  %v1122_v25 = vmul.f32 %v1671_v58, %v2105_v56 }
  0x70   : > { %v485_v7 = vsel %vm425_vm0, 0.0, %v453_v33  ;;  %v549_v61 = vsel %vm539_vm1, %v512_v59, %v530_v40  ;;  %v1085_v44 = vadd.f32 %v1053_v19, %v1017_v32  ;;  %v435_v8 = vsel %vm425_vm0, %v398_v5, %v416_v28 }
  0x71   : > { %v650_v0 = vmul.f32 %v1587_v10, %v485_v7  ;;  %v786_v38 = vmul.f32 %v1608_v20, %v549_v61  ;;  %v852_v17 = vmul.f32 %v1591_v12, %v485_v7  ;;  %v950_v16 = vadd.f32 %v918_v18, %v882_v34 }
  0x72   : > { %v988_v55 = vmul.f32 %v1667_v54, %v549_v61  ;;  %v1054_v2 = vmul.f32 %v1669_v57, %v485_v7  ;;  %v1153_v3 = vadd.f32 %v1121_v35, %v1085_v44  ;;  %v567_v39 = vsel %vm539_vm1, %v530_v40, %v512_v59 }
  0x73   : > { %v682_v36 = vadd.f32 %v1636_v37, %v650_v0  ;;  %v1018_v30 = vadd.f32 %v986_v4, %v950_v16  ;;  %v601_v42 = vsel %vm577_vm2, 0.0, %v567_v39  ;;  %v651_v63 = vmul.f32 %v1587_v10, %v435_v8 }
  0x74   : > { %v719_v48 = vmul.f32 %v1589_v11, %v2108_v60  ;;  %v1221_v45 = vadd.f32 %v1189_v52, %v1153_v3  ;;  %v1190_v47 = vmul.f32 %v1679_v62, %v549_v61  ;;  %v787_v49 = vmul.f32 %v1608_v20, %v601_v42 }
  0x75   : > { %v750_v46 = vadd.f32 %v718_v6, %v682_v36  ;;  %v1086_v50 = vadd.f32 %v1054_v2, %v1018_v30  ;;  %v683_v53 = vadd.f32 %v1636_v37, %v651_v63  ;;  %v883_v26 = vadd.f32 %v851_v21, %v2067_v24 }
  0x76   : > { %v919_v4 = vmul.f32 %v1642_v41, %v2050_v27  ;;  %1254 = vst.msk [vmem:[%s1748_s11 + $0x68] sm:$0xff] %vm1240_vm3, %v1221_v45  ;;  %v853_v29 = vmul.f32 %v1591_v12, %v435_v8  ;;  %v2180_v19 = vmul.f32 %v1667_v54, %v601_v42  ;;  %v1055_v23 = vmul.f32 %v1669_v57, %v435_v8 }
  0x77   : > { %v2176_v51 = vadd.f32 %v786_v38, %v750_v46  ;;  %v1154_v35 = vadd.f32 %v1122_v25, %v1086_v50  ;;  %v751_v24 = vadd.f32 %v719_v48, %v683_v53  ;;  %v1123_v27 = vmul.f32 %v1671_v58, %v2108_v60  ;;  %v2227_v50 = vld [vmem:[%s1568_s27 + $0xa0] sm:$0xff]  ;;  %v2230_v53 = vld [vmem:[%s1568_s27 + $0xa8] sm:$0xff] }
  0x78   : > { %v951_v21 = vadd.f32 %v919_v4, %v883_v26  ;;  %v399_v5 = vrot.slane %v2169_v15, 7  ;;  %v417_v28 = vrot.slane %v2172_v9, 7  ;;  %v513_v14 = vrot.slane %v2169_v15, 1 }
  0x79   : > { %v531_v52 = vrot.slane %v2172_v9, 1  ;;  %v1222_v59 = vadd.f32 %v1190_v47, %v1154_v35  ;;  %v2189_v40 = vadd.f32 %v787_v49, %v751_v24  ;;  %v1191_v33 = vmul.f32 %v1679_v62, %v601_v42 }
  0x7a   : > { %v1019_v32 = vadd.f32 %v2117_v43, %v951_v21  ;;  %v454_v34 = vsel %vm425_vm0, %v417_v28, %v399_v5  ;;  %v884_v61 = vadd.f32 %v852_v17, %v2119_v22  ;;  %v920_v6 = vmul.f32 %v1642_v41, %v2105_v56 }
  0x7b   : > { %v550_v7 = vsel %vm539_vm1, %v513_v14, %v531_v52  ;;  %1255 = vst.msk [vmem:[%s1748_s11 + $0x70] sm:$0xff] %vm1240_vm3, %v1222_v59  ;;  %v487_v44 = vsel %vm425_vm0, 0.0, %v454_v34  ;;  %v720_v43 = vmul.f32 %v1589_v11, %v2169_v15  ;;  %v1124_v2 = vmul.f32 %v1671_v58, %v2169_v15 }
  0x7c   : > { %v1087_v18 = vadd.f32 %v1055_v23, %v1019_v32  ;;  %v788_v0 = vmul.f32 %v1608_v20, %v550_v7  ;;  %v652_v38 = vmul.f32 %v1587_v10, %v487_v44  ;;  %v952_v25 = vadd.f32 %v920_v6, %v884_v61 }
  0x7d   : > { %v990_v16 = vmul.f32 %v1667_v54, %v550_v7  ;;  %v1056_v22 = vmul.f32 %v1669_v57, %v487_v44  ;;  %v854_v56 = vmul.f32 %v1591_v12, %v487_v44  ;;  %v436_v3 = vsel %vm425_vm0, %v399_v5, %v417_v28 }
  0x7e   : > { %v1155_v17 = vadd.f32 %v1123_v27, %v1087_v18  ;;  %v684_v36 = vadd.f32 %v1636_v37, %v652_v38  ;;  %v1020_v8 = vadd.f32 %v988_v55, %v952_v25  ;;  %v568_v39 = vsel %vm539_vm1, %v531_v52, %v513_v14 }
  0x7f   : > { %v653_v30 = vmul.f32 %v1587_v10, %v436_v3  ;;  %v1192_v63 = vmul.f32 %v1679_v62, %v550_v7  ;;  %v603_v48 = vsel %vm577_vm2, 0.0, %v568_v39  ;;  %v721_v45 = vmul.f32 %v1589_v11, %v2172_v9 }
  0x80   : > { %v1223_v42 = vadd.f32 %v1191_v33, %v1155_v17  ;;  %v752_v46 = vadd.f32 %v720_v43, %v684_v36  ;;  %v1088_v47 = vadd.f32 %v1056_v22, %v1020_v8  ;;  %v855_v55 = vmul.f32 %v1591_v12, %v436_v3 }
  0x81   : > { %v685_v49 = vadd.f32 %v1636_v37, %v653_v30  ;;  %v789_v26 = vmul.f32 %v1608_v20, %v603_v48  ;;  %v885_v4 = vadd.f32 %v853_v29, %v2129_v31  ;;  %v921_v23 = vmul.f32 %v1642_v41, %v2108_v60 }
  0x82   : > { %1256 = vst.msk [vmem:[%s1748_s11 + $0x78] sm:$0xff] %vm1240_vm3, %v1223_v42  ;;  %v2239_v35 = vmul.f32 %v1667_v54, %v603_v48  ;;  %v2241_v24 = vadd.f32 %v788_v0, %v752_v46  ;;  %v1156_v21 = vadd.f32 %v1124_v2, %v1088_v47  ;;  %v1057_v5 = vmul.f32 %v1669_v57, %v436_v3  ;;  %v2289_v47 = vld [vmem:[%s2627_s3] ss:$0 sm:$0xff] }
  0x83   : > { %v753_v27 = vadd.f32 %v721_v45, %v685_v49  ;;  %v953_v28 = vadd.f32 %v921_v23, %v885_v4  ;;  %v1125_v14 = vmul.f32 %v1671_v58, %v2172_v9  ;;  %v400_v52 = vrot.slane %v2227_v50, 7  ;;  %v2296_v4 = vld [vmem:[%s1568_s27 + $0xb0] sm:$0xff]  ;;  %v2299_v23 = vld [vmem:[%s1568_s27 + $0xb8] sm:$0xff] }
  0x84   : > { %v418_v31 = vrot.slane %v2230_v53, 7  ;;  %v1224_v29 = vadd.f32 %v1192_v63, %v1156_v21  ;;  %v1193_v60 = vmul.f32 %v1679_v62, %v603_v48  ;;  %v514_v59 = vrot.slane %v2227_v50, 1 }
  0x85   : > { %v532_v32 = vrot.slane %v2230_v53, 1  ;;  %v2251_v33 = vadd.f32 %v789_v26, %v753_v27  ;;  %v1021_v34 = vadd.f32 %v2180_v19, %v953_v28  ;;  %v886_v61 = vadd.f32 %v854_v56, %v2176_v51 }
  0x86   : > { %v455_v7 = vsel %vm425_vm0, %v418_v31, %v400_v52  ;;  %1257 = vst.msk [vmem:[%s1748_s11 + $0x80] sm:$0xff] %vm1240_vm3, %v1224_v29  ;;  %v722_v44 = vmul.f32 %v1589_v11, %v2227_v50  ;;  %v922_v43 = vmul.f32 %v1642_v41, %v2169_v15  ;;  %v1126_v51 = vmul.f32 %v1671_v58, %v2227_v50 }
  0x87   : > { %v489_v6 = vsel %vm425_vm0, 0.0, %v455_v7  ;;  %v551_v18 = vsel %vm539_vm1, %v514_v59, %v532_v32  ;;  %v1089_v19 = vadd.f32 %v1057_v5, %v1021_v34  ;;  %v437_v15 = vsel %vm425_vm0, %v400_v52, %v418_v31 }
  0x88   : > { %v654_v0 = vmul.f32 %v1587_v10, %v489_v6  ;;  %v790_v38 = vmul.f32 %v1608_v20, %v551_v18  ;;  %v856_v25 = vmul.f32 %v1591_v12, %v489_v6  ;;  %v954_v22 = vadd.f32 %v922_v43, %v886_v61 }
  0x89   : > { %v992_v17 = vmul.f32 %v1667_v54, %v551_v18  ;;  %v1058_v56 = vmul.f32 %v1669_v57, %v489_v6  ;;  %v1157_v2 = vadd.f32 %v1125_v14, %v1089_v19  ;;  %v569_v36 = vsel %vm539_vm1, %v532_v32, %v514_v59 }
  0x8a   : > { %v686_v3 = vadd.f32 %v1636_v37, %v654_v0  ;;  %v1022_v8 = vadd.f32 %v990_v16, %v954_v22  ;;  %v605_v39 = vsel %vm577_vm2, 0.0, %v569_v36  ;;  %v655_v30 = vmul.f32 %v1587_v10, %v437_v15 }
  0x8b   : > { %v723_v42 = vmul.f32 %v1589_v11, %v2230_v53  ;;  %v1225_v63 = vadd.f32 %v1193_v60, %v1157_v2  ;;  %v1194_v48 = vmul.f32 %v1679_v62, %v551_v18  ;;  %v791_v45 = vmul.f32 %v1608_v20, %v605_v39 }
  0x8c   : > { %v754_v37 = vadd.f32 %v722_v44, %v686_v3  ;;  %v1090_v46 = vadd.f32 %v1058_v56, %v1022_v8  ;;  %v687_v16 = vadd.f32 %v2289_v47, %v655_v30  ;;  %v887_v49 = vadd.f32 %v855_v55, %v2189_v40 }
  0x8d   : > { %v923_v26 = vmul.f32 %v1642_v41, %v2172_v9  ;;  %1258 = vst.msk [vmem:[%s1748_s11 + $0x88] sm:$0xff] %vm1240_vm3, %v1225_v63  ;;  %v857_v27 = vmul.f32 %v1591_v12, %v437_v15  ;;  %v2307_v5 = vmul.f32 %v1667_v54, %v605_v39  ;;  %v1059_v28 = vmul.f32 %v1669_v57, %v437_v15 }
  0x8e   : > { %v2303_v21 = vadd.f32 %v790_v38, %v754_v37  ;;  %v1158_v14 = vadd.f32 %v1126_v51, %v1090_v46  ;;  %v755_v40 = vadd.f32 %v723_v42, %v687_v16  ;;  %v1127_v9 = vmul.f32 %v1671_v58, %v2230_v53  ;;  %v2354_v46 = vld [vmem:[%s1568_s27 + $0xc0] sm:$0xff]  ;;  %v2357_v16 = vld [vmem:[%s1568_s27 + $0xc8] sm:$0xff] }
  0x8f   : > { %v955_v55 = vadd.f32 %v923_v26, %v887_v49  ;;  %v401_v52 = vrot.slane %v2296_v4, 7  ;;  %v419_v31 = vrot.slane %v2299_v23, 7  ;;  %v515_v29 = vrot.slane %v2296_v4, 1 }
  0x90   : > { %v533_v60 = vrot.slane %v2299_v23, 1  ;;  %v1226_v59 = vadd.f32 %v1194_v48, %v1158_v14  ;;  %v2316_v32 = vadd.f32 %v791_v45, %v755_v40  ;;  %v1195_v7 = vmul.f32 %v1679_v62, %v605_v39 }
  0x91   : > { %v1023_v34 = vadd.f32 %v2239_v35, %v955_v55  ;;  %v456_v61 = vsel %vm425_vm0, %v419_v31, %v401_v52  ;;  %v888_v18 = vadd.f32 %v856_v25, %v2241_v24  ;;  %v924_v44 = vmul.f32 %v1642_v41, %v2227_v50 }
  0x92   : > { %v552_v6 = vsel %vm539_vm1, %v515_v29, %v533_v60  ;;  %1259 = vst.msk [vmem:[%s1748_s11 + $0x90] sm:$0xff] %vm1240_vm3, %v1226_v59  ;;  %v491_v19 = vsel %vm425_vm0, 0.0, %v456_v61  ;;  %v724_v35 = vmul.f32 %v1589_v11, %v2296_v4  ;;  %v1128_v56 = vmul.f32 %v1671_v58, %v2296_v4 }
  0x93   : > { %v1091_v43 = vadd.f32 %v1059_v28, %v1023_v34  ;;  %v792_v0 = vmul.f32 %v1608_v20, %v552_v6  ;;  %v656_v38 = vmul.f32 %v1587_v10, %v491_v19  ;;  %v956_v51 = vadd.f32 %v924_v44, %v888_v18 }
  0x94   : > { %v994_v22 = vmul.f32 %v1667_v54, %v552_v6  ;;  %v1060_v24 = vmul.f32 %v1669_v57, %v491_v19  ;;  %v858_v50 = vmul.f32 %v1591_v12, %v491_v19  ;;  %v438_v2 = vsel %vm425_vm0, %v401_v52, %v419_v31 }
  0x95   : > { %v1159_v25 = vadd.f32 %v1127_v9, %v1091_v43  ;;  %v688_v3 = vadd.f32 %v2289_v47, %v656_v38  ;;  %v1024_v15 = vadd.f32 %v992_v17, %v956_v51  ;;  %v570_v36 = vsel %vm539_vm1, %v533_v60, %v515_v29 }
  0x96   : > { %v657_v8 = vmul.f32 %v1587_v10, %v438_v2  ;;  %v1196_v30 = vmul.f32 %v1679_v62, %v552_v6  ;;  %v607_v42 = vsel %vm577_vm2, 0.0, %v570_v36  ;;  %v725_v63 = vmul.f32 %v1589_v11, %v2299_v23 }
  0x97   : > { %v1227_v39 = vadd.f32 %v1195_v7, %v1159_v25  ;;  %v756_v37 = vadd.f32 %v724_v35, %v688_v3  ;;  %v1092_v48 = vadd.f32 %v1060_v24, %v1024_v15  ;;  %v859_v17 = vmul.f32 %v1591_v12, %v438_v2 }
  0x98   : > { %v689_v45 = vadd.f32 %v2289_v47, %v657_v8  ;;  %v793_v49 = vmul.f32 %v1608_v20, %v607_v42  ;;  %v889_v26 = vadd.f32 %v857_v27, %v2251_v33  ;;  %v925_v28 = vmul.f32 %v1642_v41, %v2230_v53 }
  0x99   : > { %1260 = vst.msk [vmem:[%s1748_s11 + $0x98] sm:$0xff] %vm1240_vm3, %v1227_v39  ;;  %v2366_v14 = vmul.f32 %v1667_v54, %v607_v42  ;;  %v2368_v40 = vadd.f32 %v792_v0, %v756_v37  ;;  %v1160_v55 = vadd.f32 %v1128_v56, %v1092_v48  ;;  %v1061_v52 = vmul.f32 %v1669_v57, %v438_v2 }
  0x9a   : > { %v757_v9 = vadd.f32 %v725_v63, %v689_v45  ;;  %v957_v31 = vadd.f32 %v925_v28, %v889_v26  ;;  %v1129_v29 = vmul.f32 %v1671_v58, %v2299_v23  ;;  %v402_v60 = vrot.slane %v2354_v46, 7  ;;  %v2418_v26 = vld [vmem:[%s1568_s27 + $0xd0] sm:$0xff]  ;;  %v2421_v28 = vld [vmem:[%s1568_s27 + $0xd8] sm:$0xff] }
  0x9b   : > { %v420_v33 = vrot.slane %v2357_v16, 7  ;;  %v1228_v27 = vadd.f32 %v1196_v30, %v1160_v55  ;;  %v1197_v53 = vmul.f32 %v1679_v62, %v607_v42  ;;  %v516_v59 = vrot.slane %v2354_v46, 1 }
  0x9c   : > { %v534_v34 = vrot.slane %v2357_v16, 1  ;;  %v2378_v7 = vadd.f32 %v793_v49, %v757_v9  ;;  %v1025_v61 = vadd.f32 %v2307_v5, %v957_v31  ;;  %v890_v18 = vadd.f32 %v858_v50, %v2303_v21 }
  0x9d   : > { %v457_v6 = vsel %vm425_vm0, %v420_v33, %v402_v60  ;;  %1261 = vst.msk [vmem:[%s1748_s11 + $0xa0] sm:$0xff] %vm1240_vm3, %v1228_v27  ;;  %v726_v19 = vmul.f32 %v1589_v11, %v2354_v46  ;;  %v926_v35 = vmul.f32 %v1642_v41, %v2296_v4  ;;  %v1130_v21 = vmul.f32 %v1671_v58, %v2354_v46 }
  0x9e   : > { %v493_v44 = vsel %vm425_vm0, 0.0, %v457_v6  ;;  %v553_v43 = vsel %vm539_vm1, %v516_v59, %v534_v34  ;;  %v1093_v5 = vadd.f32 %v1061_v52, %v1025_v61  ;;  %v439_v4 = vsel %vm425_vm0, %v402_v60, %v420_v33 }
  0x9f   : > { %v658_v0 = vmul.f32 %v1587_v10, %v493_v44  ;;  %v794_v38 = vmul.f32 %v1608_v20, %v553_v43  ;;  %v860_v51 = vmul.f32 %v1591_v12, %v493_v44  ;;  %v958_v24 = vadd.f32 %v926_v35, %v890_v18 }
  0xa0   : > { %v996_v25 = vmul.f32 %v1667_v54, %v553_v43  ;;  %v1062_v50 = vmul.f32 %v1669_v57, %v493_v44  ;;  %v1161_v56 = vadd.f32 %v1129_v29, %v1093_v5  ;;  %v571_v3 = vsel %vm539_vm1, %v534_v34, %v516_v59 }
  0xa1   : > { %v690_v2 = vadd.f32 %v2289_v47, %v658_v0  ;;  %v1026_v15 = vadd.f32 %v994_v22, %v958_v24  ;;  %v609_v36 = vsel %vm577_vm2, 0.0, %v571_v3  ;;  %v659_v8 = vmul.f32 %v1587_v10, %v439_v4 }
  0xa2   : > { %v727_v39 = vmul.f32 %v1589_v11, %v2357_v16  ;;  %v1229_v30 = vadd.f32 %v1197_v53, %v1161_v56  ;;  %v1198_v63 = vmul.f32 %v1679_v62, %v553_v43  ;;  %v795_v37 = vmul.f32 %v1608_v20, %v609_v36 }
  0xa3   : > { %v758_v42 = vadd.f32 %v726_v19, %v690_v2  ;;  %v1094_v48 = vadd.f32 %v1062_v50, %v1026_v15  ;;  %v691_v45 = vadd.f32 %v2289_v47, %v659_v8  ;;  %v891_v49 = vadd.f32 %v859_v17, %v2316_v32 }
  0xa4   : > { %v927_v22 = vmul.f32 %v1642_v41, %v2299_v23  ;;  %1262 = vst.msk [vmem:[%s1748_s11 + $0xa8] sm:$0xff] %vm1240_vm3, %v1229_v30  ;;  %v861_v9 = vmul.f32 %v1591_v12, %v439_v4  ;;  %v2429_v52 = vmul.f32 %v1667_v54, %v609_v36  ;;  %v1063_v31 = vmul.f32 %v1669_v57, %v439_v4 }
  0xa5   : > { %v2425_v55 = vadd.f32 %v794_v38, %v758_v42  ;;  %v1162_v29 = vadd.f32 %v1130_v21, %v1094_v48  ;;  %v759_v32 = vadd.f32 %v727_v39, %v691_v45  ;;  %v1131_v23 = vmul.f32 %v1671_v58, %v2357_v16  ;;  %v2476_v48 = vld [vmem:[%s1568_s27 + $0xe0] sm:$0xff]  ;;  %v2479_v45 = vld [vmem:[%s1568_s27 + $0xe8] sm:$0xff] }
  0xa6   : > { %v959_v17 = vadd.f32 %v927_v22, %v891_v49  ;;  %v403_v60 = vrot.slane %v2418_v26, 7  ;;  %v421_v33 = vrot.slane %v2421_v28, 7  ;;  %v517_v27 = vrot.slane %v2418_v26, 1 }
  0xa7   : > { %v535_v53 = vrot.slane %v2421_v28, 1  ;;  %v1230_v59 = vadd.f32 %v1198_v63, %v1162_v29  ;;  %v2438_v34 = vadd.f32 %v795_v37, %v759_v32  ;;  %v1199_v6 = vmul.f32 %v1679_v62, %v609_v36 }
  0xa8   : > { %v1027_v61 = vadd.f32 %v2366_v14, %v959_v17  ;;  %v458_v18 = vsel %vm425_vm0, %v421_v33, %v403_v60  ;;  %v892_v43 = vadd.f32 %v860_v51, %v2368_v40  ;;  %v928_v19 = vmul.f32 %v1642_v41, %v2354_v46 }
  0xa9   : > { %v554_v44 = vsel %vm539_vm1, %v517_v27, %v535_v53  ;;  %1263 = vst.msk [vmem:[%s1748_s11 + $0xb0] sm:$0xff] %vm1240_vm3, %v1230_v59  ;;  %v495_v5 = vsel %vm425_vm0, 0.0, %v458_v18  ;;  %v728_v14 = vmul.f32 %v1589_v11, %v2418_v26  ;;  %v1132_v50 = vmul.f32 %v1671_v58, %v2418_v26 }
  0xaa   : > { %v1095_v35 = vadd.f32 %v1063_v31, %v1027_v61  ;;  %v796_v0 = vmul.f32 %v1608_v20, %v554_v44  ;;  %v660_v38 = vmul.f32 %v1587_v10, %v495_v5  ;;  %v960_v21 = vadd.f32 %v928_v19, %v892_v43 }
  0xab   : > { %v998_v24 = vmul.f32 %v1667_v54, %v554_v44  ;;  %v1064_v40 = vmul.f32 %v1669_v57, %v495_v5  ;;  %v862_v46 = vmul.f32 %v1591_v12, %v495_v5  ;;  %v440_v56 = vsel %vm425_vm0, %v403_v60, %v421_v33 }
  0xac   : > { %v1163_v51 = vadd.f32 %v1131_v23, %v1095_v35  ;;  %v692_v2 = vadd.f32 %v2289_v47, %v660_v38  ;;  %v1028_v4 = vadd.f32 %v996_v25, %v960_v21  ;;  %v572_v3 = vsel %vm539_vm1, %v535_v53, %v517_v27 }
  0xad   : > { %v661_v15 = vmul.f32 %v1587_v10, %v440_v56  ;;  %v1200_v8 = vmul.f32 %v1679_v62, %v554_v44  ;;  %v611_v39 = vsel %vm577_vm2, 0.0, %v572_v3  ;;  %v729_v30 = vmul.f32 %v1589_v11, %v2421_v28 }
  0xae   : > { %v1231_v36 = vadd.f32 %v1199_v6, %v1163_v51  ;;  %v760_v42 = vadd.f32 %v728_v14, %v692_v2  ;;  %v1096_v63 = vadd.f32 %v1064_v40, %v1028_v4  ;;  %v863_v25 = vmul.f32 %v1591_v12, %v440_v56 }
  0xaf   : > { %v693_v37 = vadd.f32 %v2289_v47, %v661_v15  ;;  %v797_v49 = vmul.f32 %v1608_v20, %v611_v39  ;;  %v893_v22 = vadd.f32 %v861_v9, %v2378_v7  ;;  %v929_v31 = vmul.f32 %v1642_v41, %v2357_v16 }
  0xb0   : > { %1264 = vst.msk [vmem:[%s1748_s11 + $0xb8] sm:$0xff] %vm1240_vm3, %v1231_v36  ;;  %v999_v29 = vmul.f32 %v1667_v54, %v611_v39  ;;  %v2488_v32 = vadd.f32 %v796_v0, %v760_v42  ;;  %v1164_v17 = vadd.f32 %v1132_v50, %v1096_v63  ;;  %v1065_v60 = vmul.f32 %v1669_v57, %v440_v56 }
  0xb1   : > { %v761_v23 = vadd.f32 %v729_v30, %v693_v37  ;;  %v961_v33 = vadd.f32 %v929_v31, %v893_v22  ;;  %v1133_v27 = vmul.f32 %v1671_v58, %v2421_v28  ;;  %v404_v53 = vrot.slane %v2476_v48, 7  ;;  %v381_v22 = vld [vmem:[%s1568_s27 + $0xf0] sm:$0xff]  ;;  %v2539_v31 = vld [vmem:[%s1568_s27 + $0xf8] sm:$0xff] }
  0xb2   : > { %v422_v7 = vrot.slane %v2479_v45, 7  ;;  %v1232_v9 = vadd.f32 %v1200_v8, %v1164_v17  ;;  %v1201_v16 = vmul.f32 %v1679_v62, %v611_v39  ;;  %v518_v59 = vrot.slane %v2476_v48, 1 }
  0xb3   : > { %v536_v61 = vrot.slane %v2479_v45, 1  ;;  %v2498_v6 = vadd.f32 %v797_v49, %v761_v23  ;;  %v1029_v18 = vadd.f32 %v2429_v52, %v961_v33  ;;  %v894_v43 = vadd.f32 %v862_v46, %v2425_v55 }
  0xb4   : > { %v459_v44 = vsel %vm425_vm0, %v422_v7, %v404_v53  ;;  %1265 = vst.msk [vmem:[%s1748_s11 + $0xc0] sm:$0xff] %vm1240_vm3, %v1232_v9  ;;  %v730_v5 = vmul.f32 %v1589_v11, %v2476_v48  ;;  %v930_v14 = vmul.f32 %v1642_v41, %v2418_v26  ;;  %v1134_v55 = vmul.f32 %v1671_v58, %v2476_v48 }
  0xb5   : > { %v497_v19 = vsel %vm425_vm0, 0.0, %v459_v44  ;;  %v555_v35 = vsel %vm539_vm1, %v518_v59, %v536_v61  ;;  %v1097_v52 = vadd.f32 %v1065_v60, %v1029_v18  ;;  %v441_v26 = vsel %vm425_vm0, %v404_v53, %v422_v7 }
  0xb6   : > { %v662_v0 = vmul.f32 %v1587_v10, %v497_v19  ;;  %v798_v38 = vmul.f32 %v1608_v20, %v555_v35  ;;  %v864_v21 = vmul.f32 %v1591_v12, %v497_v19  ;;  %v962_v40 = vadd.f32 %v930_v14, %v894_v43 }
  0xb7   : > { %v1000_v51 = vmul.f32 %v1667_v54, %v555_v35  ;;  %v1066_v46 = vmul.f32 %v1669_v57, %v497_v19  ;;  %v1165_v50 = vadd.f32 %v1133_v27, %v1097_v52  ;;  %v573_v2 = vsel %vm539_vm1, %v536_v61, %v518_v59 }
  0xb8   : > { %v694_v56 = vadd.f32 %v2289_v47, %v662_v0  ;;  %v1030_v4 = vadd.f32 %v998_v24, %v962_v40  ;;  %v613_v3 = vsel %vm577_vm2, 0.0, %v573_v2  ;;  %v663_v15 = vmul.f32 %v1587_v10, %v441_v26  ;;  %v1450_v40 = vld [vmem:[%s1573_s30 + $0x18] sm:$0xff] }
  0xb9   : > { %v731_v36 = vmul.f32 %v1589_v11, %v2479_v45  ;;  %v1233_v8 = vadd.f32 %v1201_v16, %v1165_v50  ;;  %v1202_v30 = vmul.f32 %v1679_v62, %v555_v35  ;;  %v799_v42 = vmul.f32 %v1608_v20, %v613_v3 }
  0xba   : > { %v762_v39 = vadd.f32 %v730_v5, %v694_v56  ;;  %v1098_v63 = vadd.f32 %v1066_v46, %v1030_v4  ;;  %v695_v37 = vadd.f32 %v2289_v47, %v663_v15  ;;  %v895_v49 = vadd.f32 %v863_v25, %v2438_v34 }
  0xbb   : > { %v931_v24 = vmul.f32 %v1642_v41, %v2421_v28  ;;  %1266 = vst.msk [vmem:[%s1748_s11 + $0xc8] sm:$0xff] %vm1240_vm3, %v1233_v8  ;;  %v865_v11 = vmul.f32 %v1591_v12, %v441_v26  ;;  %v1001_v17 = vmul.f32 %v1667_v54, %v613_v3  ;;  %v1067_v20 = vmul.f32 %v1669_v57, %v441_v26 }
  0xbc   : > { %v830_v10 = vadd.f32 %v798_v38, %v762_v39  ;;  %v1166_v23 = vadd.f32 %v1134_v55, %v1098_v63  ;;  %v763_v47 = vadd.f32 %v731_v36, %v695_v37  ;;  %v1135_v34 = vmul.f32 %v1671_v58, %v2479_v45 }
  0xbd   : > { %v963_v60 = vadd.f32 %v931_v24, %v895_v49  ;;  %v405_v28 = vrot.slane %v381_v22, 7  ;;  %v423_v25 = vrot.slane %v2539_v31, 7  ;;  %v519_v33 = vrot.slane %v381_v22, 1 }
  0xbe   : > { %v537_v27 = vrot.slane %v2539_v31, 1  ;;  %v1234_v53 = vadd.f32 %v1202_v30, %v1166_v23  ;;  %v1203_v9 = vmul.f32 %v1679_v62, %v613_v3  ;;  %v896_v16 = vadd.f32 %v864_v21, %v2488_v32  ;;  %v1449_v21 = vld [vmem:[%s1573_s30 + $0x10] sm:$0xff] }
  0xbf   : > { %v1031_v7 = vadd.f32 %v999_v29, %v963_v60  ;;  %v831_v59 = vadd.f32 %v799_v42, %v763_v47  ;;  %v460_v61 = vsel %vm425_vm0, %v423_v25, %v405_v28  ;;  %v932_v44 = vmul.f32 %v1642_v41, %v2476_v48 }
  0xc0   : > { %v556_v18 = vsel %vm539_vm1, %v519_v33, %v537_v27  ;;  %1267 = vst.msk [vmem:[%s1748_s11 + $0xd0] sm:$0xff] %vm1240_vm3, %v1234_v53  ;;  %v499_v29 = vsel %vm425_vm0, 0.0, %v460_v61  ;;  %v1136_v19 = vmul.f32 %v1671_v58, %v381_v22  ;;  %v442_v52 = vsel %vm425_vm0, %v405_v28, %v423_v25 }
  0xc1   : > { %v1099_v43 = vadd.f32 %v1067_v20, %v1031_v7  ;;  %v1002_v32 = vmul.f32 %v1667_v54, %v556_v18  ;;  %v964_v35 = vadd.f32 %v932_v44, %v896_v16  ;;  %v1068_v5 = vmul.f32 %v1669_v57, %v499_v29 }
  0xc2   : > { %v1204_v14 = vmul.f32 %v1679_v62, %v556_v18  ;;  %v866_v48 = vmul.f32 %v1591_v12, %v499_v29  ;;  %v574_v38 = vsel %vm539_vm1, %v537_v27, %v519_v33  ;;  %v897_v55 = vadd.f32 %v865_v11, %v2498_v6 }
  0xc3   : > { %v1167_v0 = vadd.f32 %v1135_v34, %v1099_v43  ;;  %v1032_v46 = vadd.f32 %v1000_v51, %v964_v35  ;;  %v615_v50 = vsel %vm577_vm2, 0.0, %v574_v38  ;;  %v867_v56 = vmul.f32 %v1591_v12, %v442_v52 }
  0xc4   : > { %v933_v26 = vmul.f32 %v1642_v41, %v2479_v45  ;;  %v1003_v4 = vmul.f32 %v1667_v54, %v615_v50  ;;  %v1069_v3 = vmul.f32 %v1669_v57, %v442_v52  ;;  %v1137_v15 = vmul.f32 %v1671_v58, %v2539_v31 }
  0xc5   : > { %v1235_v2 = vadd.f32 %v1203_v9, %v1167_v0  ;;  %v1100_v6 = vadd.f32 %v1068_v5, %v1032_v46  ;;  %v406_v8 = vrot.slane %v1449_v21, 7  ;;  %v424_v51 = vrot.slane %v1450_v40, 7 }
  0xc6   : > { %v965_v36 = vadd.f32 %v933_v26, %v897_v55  ;;  %v520_v39 = vrot.slane %v1449_v21, 1  ;;  %v538_v30 = vrot.slane %v1450_v40, 1  ;;  %v898_v12 = vadd.f32 %v866_v48, %v830_v10 }
  0xc7   : > { %1268 = vst.msk [vmem:[%s1748_s11 + $0xd8] sm:$0xff] %vm1240_vm3, %v1235_v2  ;;  %v934_v42 = vmul.f32 %v1642_v41, %v381_v22  ;;  %v1168_v45 = vadd.f32 %v1136_v19, %v1100_v6  ;;  %v1205_v54 = vmul.f32 %v1679_v62, %v615_v50  ;;  %v461_v37 = vsel %vm425_vm0, %v424_v51, %v406_v8 }
  0xc8   : > { %v1033_v63 = vadd.f32 %v1001_v17, %v965_v36  ;;  %v501_v49 = vsel %vm425_vm0, 0.0, %v461_v37  ;;  %v557_v24 = vsel %vm539_vm1, %v520_v39, %v538_v30  ;;  %v1138_v20 = vmul.f32 %v1449_v21, %v1671_v58 }
  0xc9   : > { %v966_v11 = vadd.f32 %v934_v42, %v898_v12  ;;  %v1236_v10 = vadd.f32 %v1204_v14, %v1168_v45  ;;  %v1070_v22 = vmul.f32 %v1669_v57, %v501_v49  ;;  %v443_v17 = vsel %vm425_vm0, %v406_v8, %v424_v51 }
  0xca   : > { %v1101_v23 = vadd.f32 %v1069_v3, %v1033_v63  ;;  %v575_v60 = vsel %vm539_vm1, %v538_v30, %v520_v39  ;;  %v899_v34 = vadd.f32 %v867_v56, %v831_v59  ;;  %v935_v28 = vmul.f32 %v1642_v41, %v2539_v31 }
  0xcb   : > { %v1034_v47 = vadd.f32 %v1002_v32, %v966_v11  ;;  %1269 = vst.msk [vmem:[%s1748_s11 + $0xe0] sm:$0xff] %vm1240_vm3, %v1236_v10  ;;  %v1206_v27 = vmul.f32 %v1679_v62, %v557_v24  ;;  %v1071_v7 = vmul.f32 %v1669_v57, %v443_v17  ;;  %v617_v1 = vsel %vm577_vm2, 0.0, %v575_v60 }
  0xcc   : > { %v1169_v25 = vadd.f32 %v1137_v15, %v1101_v23  ;;  %v967_v53 = vadd.f32 %v935_v28, %v899_v34  ;;  %v1139_v61 = vmul.f32 %v1450_v40, %v1671_v58  ;;  %v1207_v18 = vmul.f32 %v1679_v62, %v617_v1 }
  0xcd   : > { %v1102_v33 = vadd.f32 %v1070_v22, %v1034_v47 }
  0xce   : > { %v1237_v9 = vadd.f32 %v1205_v54, %v1169_v25  ;;  %v1035_v59 = vadd.f32 %v1003_v4, %v967_v53 }
  0xcf   : > { %v1170_v16 = vadd.f32 %v1138_v20, %v1102_v33 }
  0xd0   : > { %1270 = vst.msk [vmem:[%s1748_s11 + $0xe8] sm:$0xff] %vm1240_vm3, %v1237_v9  ;;  %v1103_v31 = vadd.f32 %v1071_v7, %v1035_v59 }
  0xd1   : > { %v1238_v41 = vadd.f32 %v1206_v27, %v1170_v16 }
  0xd2   : > { %v1171_v44 = vadd.f32 %v1139_v61, %v1103_v31 }
  0xd3   : > { %1271 = vst.msk [vmem:[%s1748_s11 + $0xf0] sm:$0xff] %vm1240_vm3, %v1238_v41 }
  0xd4   : > { %v1239_v43 = vadd.f32 %v1207_v18, %v1171_v44 }
  0xd6   : > { %1272 = vst.msk [vmem:[%s1748_s11 + $0xf8] sm:$0xff] %vm1240_vm3, %v1239_v43 }
  0xd7 PF: > { %s14_s17 = sadd.s32 1, %s1504_s17   ;;  %s2629_s15 = smov %s1500_s16 }
  0xd8   : > { %p11_p5 = scmp.ge.s32.totalorder %s14_s17, 4   ;;  %s2630_s16 = smov %s2632_s18 }
  0xda   :  { %13 = sbr.rel (!%p11_p5) target bundleno = 2 (0x2), region = 76 }

</bundles_post_ra>
